<compile_context>
chip_gen: v7x
topology: tpu7x:2x2x1
jax: 0.10.0
libtpu: 0.0.40
codegen_flags: <defaults>
</compile_context>

<pallas_src>
import jax
import jax.numpy as jnp
import numpy as np
from jax.experimental import pallas as pl
from jax.experimental.pallas import tpu as pltpu


def _mlp_kernel(x_ref, w1_ref, b1_ref, w2_ref, b2_ref, w3_ref, b3_ref, o_ref):
    # Layer 1: SpectralLinear(D -> H) + ReLU   (dropout = identity at eval)
    x = x_ref[...].astype(jnp.bfloat16)
    h = jnp.dot(x, w1_ref[...], preferred_element_type=jnp.float32)
    h = jnp.maximum(h + b1_ref[...], 0.0)
    # Layer 2: SpectralLinear(H -> H) + ReLU
    h = jnp.dot(h.astype(jnp.bfloat16), w2_ref[...],
                preferred_element_type=jnp.float32)
    h = jnp.maximum(h + b2_ref[...], 0.0)
    # Layer 3: SpectralLinear(H -> D)
    out = jnp.dot(h.astype(jnp.bfloat16), w3_ref[...],
                  preferred_element_type=jnp.float32)
    out = out + b3_ref[...]
    o_ref[...] = out.astype(o_ref.dtype)


def discriminator_forward(x, params, *, block_b=512):
    """x: (B, D) bf16 (or f32).  params: bf16 spectrally-normalized weights, f32 biases."""
    B, D = x.shape
    w1, b1 = params["w1"], params["b1"]   # (D, H) bf16, (1, H) f32
    w2, b2 = params["w2"], params["b2"]   # (H, H) bf16, (1, H) f32
    w3, b3 = params["w3"], params["b3"]   # (H, D) bf16, (1, D) f32
    H = w1.shape[1]

    # Batch tile selection:
    #  * large B: block_b-row tiles (multiple of 16 sublanes for bf16 input).
    #  * medium B: split into >=2 grid steps so the "parallel" axis shards
    #    across v7x's two TensorCores.
    #  * tiny B: one full-extent block (exempt from the (8,128) rule).
    if B > block_b:
        tb = block_b
    elif B >= 32:
        tb = ((pl.cdiv(B, 2) + 15) // 16) * 16
    else:
        tb = B
    grid_b = pl.cdiv(B, tb)   # partial last block is clipped by Pallas

    weight_elems = D * H + H * H + H * D
    flops = 2 * B * weight_elems
    x_bytes = x.dtype.itemsize
    bytes_accessed = (B * D * x_bytes          # x in (bf16)
                      + B * D * 4              # out (f32)
                      + 2 * weight_elems       # bf16 weights
                      + 4 * (2 * H + D))       # f32 biases

    # VMEM budget (counting 2 buffers for every operand to stay conservative
    # even when single-buffered weights are unavailable), with headroom and a
    # generation-aware cap derived from the actual chip's VMEM capacity.
    weight_bytes = 2 * weight_elems + 4 * (2 * H + D)
    io_bytes = 2 * (tb * D * x_bytes) + 2 * (tb * D * 4)   # x + out, double-buffered
    act_bytes = 2 * tb * H * (4 + 2)                       # f32 hidden + bf16 recast
    vmem_needed = 2 * weight_bytes + io_bytes + act_bytes
    try:
        vmem_cap = int(pltpu.get_tpu_info().vmem_capacity_bytes)
    except Exception:
        vmem_cap = 64 * 1024 * 1024   # conservative (v7x per-TC VMEM)
    vmem_limit = int(min(max(int(1.5 * vmem_needed), 16 * 1024 * 1024),
                         int(0.85 * vmem_cap)))   # ~15% headroom for compiler scratch

    def _build(single_buffer_weights):
        def resident(shape):
            # Constant index_map -> DMA'd once, VMEM-resident across all
            # batch-grid iterations; single-buffered when supported.
            if single_buffer_weights:
                return pl.BlockSpec(shape, lambda i: (0,) * len(shape),
                                    pipeline_mode=pl.Buffered(1))
            return pl.BlockSpec(shape, lambda i: (0,) * len(shape))

        return pl.pallas_call(
            _mlp_kernel,
            out_shape=jax.ShapeDtypeStruct((B, D), jnp.float32),
            grid=(grid_b,),
            in_specs=[
                # NOTE: if profiling shows exposed input DMA at large tb,
                # add pipeline_mode=pl.Buffered(3) here.
                pl.BlockSpec((tb, D), lambda i: (i, 0)),
                resident((D, H)), resident((1, H)),
                resident((H, H)), resident((1, H)),
                resident((H, D)), resident((1, D)),
            ],
            out_specs=pl.BlockSpec((tb, D), lambda i: (i, 0)),
            compiler_params=pltpu.CompilerParams(
                dimension_semantics=("parallel",),
                vmem_limit_bytes=vmem_limit,
            ),
            cost_estimate=pl.CostEstimate(
                flops=flops, transcendentals=0, bytes_accessed=bytes_accessed),
        )

    args = (x, w1, b1, w2, b2, w3, b3)
    try:
        return _build(True)(*args)
    except Exception:
        # pipeline_mode=pl.Buffered(1) not supported on this jax version for
        # pallas_call operands -> default double-buffered resident weights.
        return _build(False)(*args)


# ---------------- parameter setup (plain-JAX glue, done once) ----------------

def _spectral_normalize(w, u, n_power_iterations=1, eps=1e-12):
    """Mimics torch.nn.utils.spectral_norm: divide W (out, in) by its largest
    singular value estimated via power iteration with persistent vector u."""
    def _l2norm(v):
        return v / (jnp.sqrt(jnp.sum(v * v)) + eps)

    v = None
    for _ in range(n_power_iterations):
        v = _l2norm(w.T @ u)   # (in,)
        u = _l2norm(w @ v)     # (out,)
    sigma = u @ (w @ v)
    return w / sigma


def _linear_init(key, in_dim, out_dim):
    """PyTorch nn.Linear default init: U(-1/sqrt(in), 1/sqrt(in))."""
    kw, kb = jax.random.split(key)
    bound = 1.0 / np.sqrt(in_dim)
    w = jax.random.uniform(kw, (out_dim, in_dim), jnp.float32, -bound, bound)
    b = jax.random.uniform(kb, (out_dim,), jnp.float32, -bound, bound)
    return w, b


def make_params(key, D):
    """Build the 3 spectrally-normalized layers; weights cast to bf16 once."""
    H = 2 * D
    dims = [(D, H), (H, H), (H, D)]
    params = {}
    keys = jax.random.split(key, 2 * len(dims))
    k_lip = 1.0 ** (1.0 / 3.0)                      # == 1.0 (kept for fidelity)
    for i, (din, dout) in enumerate(dims):
        w, b = _linear_init(keys[2 * i], din, dout)
        u = jax.random.normal(keys[2 * i + 1], (dout,), jnp.float32)
        u = u / (jnp.linalg.norm(u) + 1e-12)
        w_sn = _spectral_normalize(w, u)             # (out, in), f32
        # Stored transposed (in, out) so the kernel computes x @ W^T + b like
        # PyTorch; cast to bf16 here (once), accumulate in f32 on the MXU.
        params[f"w{i + 1}"] = (k_lip * w_sn).T.astype(jnp.bfloat16)
        params[f"b{i + 1}"] = (k_lip * b).reshape(1, dout).astype(jnp.float32)
    return params


def _reference_forward(x, params):
    """Pure-JAX reference with identical numerics (bf16 inputs, f32 accum)."""
    h = jnp.dot(x.astype(jnp.bfloat16), params["w1"],
                preferred_element_type=jnp.float32)
    h = jnp.maximum(h + params["b1"], 0.0)
    h = jnp.dot(h.astype(jnp.bfloat16), params["w2"],
                preferred_element_type=jnp.float32)
    h = jnp.maximum(h + params["b2"], 0.0)
    out = jnp.dot(h.astype(jnp.bfloat16), params["w3"],
                  preferred_element_type=jnp.float32)
    return out + params["b3"]


if __name__ == "__main__":
    key = jax.random.PRNGKey(0)
    k_x, k_p = jax.random.split(key)

    # Module-consistent shapes: features D, hidden 2D.  B chosen so the batch
    # splits into 2 grid steps (v7x megacore) with a partial last block,
    # exercising the pad-free clipping path; D=128 keeps tiles lane-dense.
    B, D = 200, 128
    x = jax.random.normal(k_x, (B, D), jnp.float32).astype(jnp.bfloat16)
    params = make_params(k_p, D)

    out = jax.block_until_ready(discriminator_forward(x, params))

    ref = _reference_forward(x, params)
    assert out.shape == (B, D)
    np.testing.assert_allclose(np.asarray(out), np.asarray(ref),
                               rtol=2e-3, atol=2e-3)

    print("KERNEL_OK")
</pallas_src>

<mosaic_0001>
module attributes {stable_mosaic.version = 11 : i64} {
  func.func @_mlp_kernel(%arg0: i32, %arg1: memref<112x128xbf16, #tpu.memory_space<vmem>>, %arg2: memref<128x256xbf16, #tpu.memory_space<vmem>>, %arg3: memref<1x256xf32, #tpu.memory_space<vmem>>, %arg4: memref<256x256xbf16, #tpu.memory_space<vmem>>, %arg5: memref<1x256xf32, #tpu.memory_space<vmem>>, %arg6: memref<256x128xbf16, #tpu.memory_space<vmem>>, %arg7: memref<1x128xf32, #tpu.memory_space<vmem>>, %arg8: memref<112x128xf32, #tpu.memory_space<vmem>>) attributes {dimension_semantics = [#tpu.dimension_semantics<parallel>], iteration_bounds = array<i64: 2>, scalar_prefetch = 0 : i64, scratch_operands = 0 : i64, tpu.core_type = #tpu.core_type<tc>, window_params = [{transform_indices = @transform_0, window_bounds = array<i64: 112, 128>}, {pipeline_mode = #tpu.pipeline_mode<synchronous>, transform_indices = @transform_1, window_bounds = array<i64: 128, 256>}, {pipeline_mode = #tpu.pipeline_mode<synchronous>, transform_indices = @transform_2, window_bounds = array<i64: 1, 256>}, {pipeline_mode = #tpu.pipeline_mode<synchronous>, transform_indices = @transform_3, window_bounds = array<i64: 256, 256>}, {pipeline_mode = #tpu.pipeline_mode<synchronous>, transform_indices = @transform_4, window_bounds = array<i64: 1, 256>}, {pipeline_mode = #tpu.pipeline_mode<synchronous>, transform_indices = @transform_5, window_bounds = array<i64: 256, 128>}, {pipeline_mode = #tpu.pipeline_mode<synchronous>, transform_indices = @transform_6, window_bounds = array<i64: 1, 128>}, {transform_indices = @transform_7, window_bounds = array<i64: 112, 128>}]} {
    %c0 = arith.constant 0 : index
    %c0_0 = arith.constant 0 : index
    %0 = vector.load %arg1[%c0, %c0_0] : memref<112x128xbf16, #tpu.memory_space<vmem>>, vector<112x128xbf16>
    %c0_1 = arith.constant 0 : index
    %c0_2 = arith.constant 0 : index
    %1 = vector.load %arg2[%c0_1, %c0_2] : memref<128x256xbf16, #tpu.memory_space<vmem>>, vector<128x256xbf16>
    %cst = arith.constant dense<0.000000e+00> : vector<112x256xf32>
    %2 = tpu.matmul %0, %1, %cst {dimension_numbers = #tpu.dot_dimension_numbers<[1], [0], [0], [1], [0, 0, 1, 1], [], []>} : vector<112x128xbf16>, vector<128x256xbf16>, vector<112x256xf32> -> vector<112x256xf32>
    %c0_3 = arith.constant 0 : index
    %c0_4 = arith.constant 0 : index
    %3 = vector.load %arg3[%c0_3, %c0_4] : memref<1x256xf32, #tpu.memory_space<vmem>>, vector<1x256xf32>
    %4 = vector.broadcast %3 : vector<1x256xf32> to vector<112x256xf32>
    %5 = arith.addf %2, %4 : vector<112x256xf32>
    %cst_5 = arith.constant 0.000000e+00 : f32
    %6 = vector.broadcast %cst_5 : f32 to vector<112x256xf32>
    %7 = arith.maximumf %5, %6 : vector<112x256xf32>
    %8 = arith.truncf %7 : vector<112x256xf32> to vector<112x256xbf16>
    %c0_6 = arith.constant 0 : index
    %c0_7 = arith.constant 0 : index
    %9 = vector.load %arg4[%c0_6, %c0_7] : memref<256x256xbf16, #tpu.memory_space<vmem>>, vector<256x256xbf16>
    %cst_8 = arith.constant dense<0.000000e+00> : vector<112x256xf32>
    %10 = tpu.matmul %8, %9, %cst_8 {dimension_numbers = #tpu.dot_dimension_numbers<[1], [0], [0], [1], [0, 0, 1, 1], [], []>} : vector<112x256xbf16>, vector<256x256xbf16>, vector<112x256xf32> -> vector<112x256xf32>
    %c0_9 = arith.constant 0 : index
    %c0_10 = arith.constant 0 : index
    %11 = vector.load %arg5[%c0_9, %c0_10] : memref<1x256xf32, #tpu.memory_space<vmem>>, vector<1x256xf32>
    %12 = vector.broadcast %11 : vector<1x256xf32> to vector<112x256xf32>
    %13 = arith.addf %10, %12 : vector<112x256xf32>
    %cst_11 = arith.constant 0.000000e+00 : f32
    %14 = vector.broadcast %cst_11 : f32 to vector<112x256xf32>
    %15 = arith.maximumf %13, %14 : vector<112x256xf32>
    %16 = arith.truncf %15 : vector<112x256xf32> to vector<112x256xbf16>
    %c0_12 = arith.constant 0 : index
    %c0_13 = arith.constant 0 : index
    %17 = vector.load %arg6[%c0_12, %c0_13] : memref<256x128xbf16, #tpu.memory_space<vmem>>, vector<256x128xbf16>
    %cst_14 = arith.constant dense<0.000000e+00> : vector<112x128xf32>
    %18 = tpu.matmul %16, %17, %cst_14 {dimension_numbers = #tpu.dot_dimension_numbers<[1], [0], [0], [1], [0, 0, 1, 1], [], []>} : vector<112x256xbf16>, vector<256x128xbf16>, vector<112x128xf32> -> vector<112x128xf32>
    %c0_15 = arith.constant 0 : index
    %c0_16 = arith.constant 0 : index
    %19 = vector.load %arg7[%c0_15, %c0_16] : memref<1x128xf32, #tpu.memory_space<vmem>>, vector<1x128xf32>
    %20 = vector.broadcast %19 : vector<1x128xf32> to vector<112x128xf32>
    %21 = arith.addf %18, %20 : vector<112x128xf32>
    %c0_17 = arith.constant 0 : index
    %c0_18 = arith.constant 0 : index
    %22 = vector.load %arg8[%c0_17, %c0_18] : memref<112x128xf32, #tpu.memory_space<vmem>>, vector<112x128xf32>
    tpu.vector_store %arg8[%c0_17, %c0_18], %21 {strides = array<i32>} : memref<112x128xf32, #tpu.memory_space<vmem>>, vector<112x128xf32>,
    return
  }
  func.func @transform_0(%arg0: i32) -> (i32, i32) {
    %c0_i32 = arith.constant 0 : i32
    %c0_i32_0 = arith.constant 0 : i32
    return %arg0, %c0_i32 : i32, i32
  }
  func.func @transform_1(%arg0: i32) -> (i32, i32) {
    %c0_i32 = arith.constant 0 : i32
    %c0_i32_0 = arith.constant 0 : i32
    %c0_i32_1 = arith.constant 0 : i32
    return %c0_i32, %c0_i32_0 : i32, i32
  }
  func.func @transform_2(%arg0: i32) -> (i32, i32) {
    %c0_i32 = arith.constant 0 : i32
    %c0_i32_0 = arith.constant 0 : i32
    %c0_i32_1 = arith.constant 0 : i32
    return %c0_i32, %c0_i32_0 : i32, i32
  }
  func.func @transform_3(%arg0: i32) -> (i32, i32) {
    %c0_i32 = arith.constant 0 : i32
    %c0_i32_0 = arith.constant 0 : i32
    %c0_i32_1 = arith.constant 0 : i32
    return %c0_i32, %c0_i32_0 : i32, i32
  }
  func.func @transform_4(%arg0: i32) -> (i32, i32) {
    %c0_i32 = arith.constant 0 : i32
    %c0_i32_0 = arith.constant 0 : i32
    %c0_i32_1 = arith.constant 0 : i32
    return %c0_i32, %c0_i32_0 : i32, i32
  }
  func.func @transform_5(%arg0: i32) -> (i32, i32) {
    %c0_i32 = arith.constant 0 : i32
    %c0_i32_0 = arith.constant 0 : i32
    %c0_i32_1 = arith.constant 0 : i32
    return %c0_i32, %c0_i32_0 : i32, i32
  }
  func.func @transform_6(%arg0: i32) -> (i32, i32) {
    %c0_i32 = arith.constant 0 : i32
    %c0_i32_0 = arith.constant 0 : i32
    %c0_i32_1 = arith.constant 0 : i32
    return %c0_i32, %c0_i32_0 : i32, i32
  }
  func.func @transform_7(%arg0: i32) -> (i32, i32) {
    %c0_i32 = arith.constant 0 : i32
    %c0_i32_0 = arith.constant 0 : i32
    return %arg0, %c0_i32 : i32, i32
  }
}

module attributes {stable_mosaic.version = 11 : i64} {
  func.func @_mlp_kernel(%arg0: i32, %arg1: memref<112x128xbf16, #tpu.memory_space<vmem>>, %arg2: memref<128x256xbf16, #tpu.memory_space<vmem>>, %arg3: memref<1x256xf32, #tpu.memory_space<vmem>>, %arg4: memref<256x256xbf16, #tpu.memory_space<vmem>>, %arg5: memref<1x256xf32, #tpu.memory_space<vmem>>, %arg6: memref<256x128xbf16, #tpu.memory_space<vmem>>, %arg7: memref<1x128xf32, #tpu.memory_space<vmem>>, %arg8: memref<112x128xf32, #tpu.memory_space<vmem>>) attributes {dimension_semantics = [#tpu.dimension_semantics<parallel>], iteration_bounds = array<i64: 2>, scalar_prefetch = 0 : i64, scratch_operands = 0 : i64, tpu.core_type = #tpu.core_type<tc>, window_params = [{transform_indices = @transform_0, window_bounds = array<i64: 112, 128>}, {pipeline_mode = #tpu.pipeline_mode<synchronous>, transform_indices = @transform_1, window_bounds = array<i64: 128, 256>}, {pipeline_mode = #tpu.pipeline_mode<synchronous>, transform_indices = @transform_2, window_bounds = array<i64: 1, 256>}, {pipeline_mode = #tpu.pipeline_mode<synchronous>, transform_indices = @transform_3, window_bounds = array<i64: 256, 256>}, {pipeline_mode = #tpu.pipeline_mode<synchronous>, transform_indices = @transform_4, window_bounds = array<i64: 1, 256>}, {pipeline_mode = #tpu.pipeline_mode<synchronous>, transform_indices = @transform_5, window_bounds = array<i64: 256, 128>}, {pipeline_mode = #tpu.pipeline_mode<synchronous>, transform_indices = @transform_6, window_bounds = array<i64: 1, 128>}, {transform_indices = @transform_7, window_bounds = array<i64: 112, 128>}]} {
    %c0 = arith.constant 0 : index
    %c0_0 = arith.constant 0 : index
    %0 = vector.load %arg1[%c0, %c0_0] : memref<112x128xbf16, #tpu.memory_space<vmem>>, vector<112x128xbf16>
    %c0_1 = arith.constant 0 : index
    %c0_2 = arith.constant 0 : index
    %1 = vector.load %arg2[%c0_1, %c0_2] : memref<128x256xbf16, #tpu.memory_space<vmem>>, vector<128x256xbf16>
    %cst = arith.constant dense<0.000000e+00> : vector<112x256xf32>
    %2 = tpu.matmul %0, %1, %cst {dimension_numbers = #tpu.dot_dimension_numbers<[1], [0], [0], [1], [0, 0, 1, 1], [], []>} : vector<112x128xbf16>, vector<128x256xbf16>, vector<112x256xf32> -> vector<112x256xf32>
    %c0_3 = arith.constant 0 : index
    %c0_4 = arith.constant 0 : index
    %3 = vector.load %arg3[%c0_3, %c0_4] : memref<1x256xf32, #tpu.memory_space<vmem>>, vector<1x256xf32>
    %4 = vector.broadcast %3 : vector<1x256xf32> to vector<112x256xf32>
    %5 = arith.addf %2, %4 : vector<112x256xf32>
    %cst_5 = arith.constant 0.000000e+00 : f32
    %6 = vector.broadcast %cst_5 : f32 to vector<112x256xf32>
    %7 = arith.maximumf %5, %6 : vector<112x256xf32>
    %8 = arith.truncf %7 : vector<112x256xf32> to vector<112x256xbf16>
    %c0_6 = arith.constant 0 : index
    %c0_7 = arith.constant 0 : index
    %9 = vector.load %arg4[%c0_6, %c0_7] : memref<256x256xbf16, #tpu.memory_space<vmem>>, vector<256x256xbf16>
    %cst_8 = arith.constant dense<0.000000e+00> : vector<112x256xf32>
    %10 = tpu.matmul %8, %9, %cst_8 {dimension_numbers = #tpu.dot_dimension_numbers<[1], [0], [0], [1], [0, 0, 1, 1], [], []>} : vector<112x256xbf16>, vector<256x256xbf16>, vector<112x256xf32> -> vector<112x256xf32>
    %c0_9 = arith.constant 0 : index
    %c0_10 = arith.constant 0 : index
    %11 = vector.load %arg5[%c0_9, %c0_10] : memref<1x256xf32, #tpu.memory_space<vmem>>, vector<1x256xf32>
    %12 = vector.broadcast %11 : vector<1x256xf32> to vector<112x256xf32>
    %13 = arith.addf %10, %12 : vector<112x256xf32>
    %cst_11 = arith.constant 0.000000e+00 : f32
    %14 = vector.broadcast %cst_11 : f32 to vector<112x256xf32>
    %15 = arith.maximumf %13, %14 : vector<112x256xf32>
    %16 = arith.truncf %15 : vector<112x256xf32> to vector<112x256xbf16>
    %c0_12 = arith.constant 0 : index
    %c0_13 = arith.constant 0 : index
    %17 = vector.load %arg6[%c0_12, %c0_13] : memref<256x128xbf16, #tpu.memory_space<vmem>>, vector<256x128xbf16>
    %cst_14 = arith.constant dense<0.000000e+00> : vector<112x128xf32>
    %18 = tpu.matmul %16, %17, %cst_14 {dimension_numbers = #tpu.dot_dimension_numbers<[1], [0], [0], [1], [0, 0, 1, 1], [], []>} : vector<112x256xbf16>, vector<256x128xbf16>, vector<112x128xf32> -> vector<112x128xf32>
    %c0_15 = arith.constant 0 : index
    %c0_16 = arith.constant 0 : index
    %19 = vector.load %arg7[%c0_15, %c0_16] : memref<1x128xf32, #tpu.memory_space<vmem>>, vector<1x128xf32>
    %20 = vector.broadcast %19 : vector<1x128xf32> to vector<112x128xf32>
    %21 = arith.addf %18, %20 : vector<112x128xf32>
    %c0_17 = arith.constant 0 : index
    %c0_18 = arith.constant 0 : index
    %22 = vector.load %arg8[%c0_17, %c0_18] : memref<112x128xf32, #tpu.memory_space<vmem>>, vector<112x128xf32>
    tpu.vector_store %arg8[%c0_17, %c0_18], %21 {strides = array<i32>} : memref<112x128xf32, #tpu.memory_space<vmem>>, vector<112x128xf32>,
    return
  }
  func.func @transform_0(%arg0: i32) -> (i32, i32) {
    %c0_i32 = arith.constant 0 : i32
    %c0_i32_0 = arith.constant 0 : i32
    return %arg0, %c0_i32 : i32, i32
  }
  func.func @transform_1(%arg0: i32) -> (i32, i32) {
    %c0_i32 = arith.constant 0 : i32
    %c0_i32_0 = arith.constant 0 : i32
    %c0_i32_1 = arith.constant 0 : i32
    return %c0_i32, %c0_i32_0 : i32, i32
  }
  func.func @transform_2(%arg0: i32) -> (i32, i32) {
    %c0_i32 = arith.constant 0 : i32
    %c0_i32_0 = arith.constant 0 : i32
    %c0_i32_1 = arith.constant 0 : i32
    return %c0_i32, %c0_i32_0 : i32, i32
  }
  func.func @transform_3(%arg0: i32) -> (i32, i32) {
    %c0_i32 = arith.constant 0 : i32
    %c0_i32_0 = arith.constant 0 : i32
    %c0_i32_1 = arith.constant 0 : i32
    return %c0_i32, %c0_i32_0 : i32, i32
  }
  func.func @transform_4(%arg0: i32) -> (i32, i32) {
    %c0_i32 = arith.constant 0 : i32
    %c0_i32_0 = arith.constant 0 : i32
    %c0_i32_1 = arith.constant 0 : i32
    return %c0_i32, %c0_i32_0 : i32, i32
  }
  func.func @transform_5(%arg0: i32) -> (i32, i32) {
    %c0_i32 = arith.constant 0 : i32
    %c0_i32_0 = arith.constant 0 : i32
    %c0_i32_1 = arith.constant 0 : i32
    return %c0_i32, %c0_i32_0 : i32, i32
  }
  func.func @transform_6(%arg0: i32) -> (i32, i32) {
    %c0_i32 = arith.constant 0 : i32
    %c0_i32_0 = arith.constant 0 : i32
    %c0_i32_1 = arith.constant 0 : i32
    return %c0_i32, %c0_i32_0 : i32, i32
  }
  func.func @transform_7(%arg0: i32) -> (i32, i32) {
    %c0_i32 = arith.constant 0 : i32
    %c0_i32_0 = arith.constant 0 : i32
    return %arg0, %c0_i32 : i32, i32
  }
}

</mosaic_0001>

<bundles_post_ra>
// kernel: tpu_custom_call.1
= control target key start
LH: loop header
LB: loop body
LE: loop exit
PB: predicated region body
PF: predicated region fallthrough
CT: control target
= control target key end

     0   :  { %s2395_s0 = inlined_call_operand.hbm [shape: bf16[200,128], index: 0, kind: input, shape index: {}]   ;;  %s2396_s1 = inlined_call_operand.hbm [shape: bf16[128,256], index: 1, kind: input, shape index: {}]   ;;  %s2397_s2 = inlined_call_operand.vmem [shape: f32[1,256], index: 2, kind: input, shape index: {}]   ;;  %s2398_s3 = inlined_call_operand.hbm [shape: bf16[256,256], index: 3, kind: input, shape index: {}]   ;;  %s2399_s4 = inlined_call_operand.vmem [shape: f32[1,256], index: 4, kind: input, shape index: {}]   ;;  %s2400_s5 = inlined_call_operand.hbm [shape: bf16[256,128], index: 5, kind: input, shape index: {}]   ;;  %s2401_s6 = inlined_call_operand.vmem [shape: f32[1,128], index: 6, kind: input, shape index: {}]   ;;  %s2402_s7 = inlined_call_operand.hbm [shape: f32[200,128], index: 7, kind: output, shape index: {}]  }
   0x1   :  { %2410 = sst [smem:[#allocation19_spill]] %s2396_s1 }
   0x2   :  { %12 = vsyncpa [#allocation3], 0 }
   0x3   :  { %14 = vsyncpa [#allocation3 + $0x1], 0 }
   0x4   :  { %15 = vsyncpa [#allocation6], 0 }
   0x5   :  { %16 = vsyncpa [#allocation9], 0 }
   0x6   :  { %17 = vsyncpa [#allocation4], 0 }
   0x7   :  { %19 = vsyncpa [#allocation4 + $0x1], 0  ;;  %s1965_s24 = smov 0   ;;  %s1967_s25 = smov 0  }
   0x8   :  { %s1969_s26 = smov 0   ;;  %s1971_s27 = smov 0  }
   0x9 LB: > { %2411 = sst [smem:[#allocation15_spill]] %s1897_s24  ;;  %s1986_s28 = sadd.s32 4294967295, %s1909_s27   ;;  %s1909_s27 = sphi %s1971_s27, %s2434_s27   ;;  %s1905_s26 = sphi %s1969_s26, %s2438_s26   ;;  %s1901_s25 = sphi %s1967_s25, %s2437_s25   ;;  %s1897_s24 = sphi %s1965_s24, %s2436_s24  }
   0xa   : > { %s1376_s29 = sadd.s32 4294967294, %s1909_s27   ;;  %s1990_s30 = sadd.s32 1, %s1909_s27  }
   0xb   : > { %2412 = sst [smem:[#allocation16_spill]] %s1990_s30  ;;  %s32_s8 = sadd.s32 1, %s1905_s26 }
   0xc   : > { %s29_s9 = ssub.s32 %s1909_s27, %s1990_s30  ;;  %p39_p0 = scmp.ne.s32.totalorder %s1905_s26, %s1901_s25 }
   0xd   : > { %p30_p1 = scmp.eq.s32.totalorder %s29_s9, 0  ;;  %p40_p2 = scmp.eq.s32.totalorder %s1909_s27, 0 }
   0xe   : > { %p45_p3 = scmp.ne.s32.totalorder %s1901_s25, %s1897_s24  ;;  %p2403_p4 = scmp.eq.s32.totalorder %s1986_s28, 0 }
   0xf   : > { %s2002_s10 = scalar_select %p30_p1, %s1905_s26, %s32_s8  }
  0x10   : > { %p2004_p5 = por %p40_p2, %p39_p0  ;;  %p2010_p6 = por %p2403_p4, %p45_p3 }
  0x11   : > { %2413 = sst [smem:[#allocation17_spill]] %s2002_s10  ;;  %p195_p7 = scmp.eq.s32.totalorder %s1986_s28, 1 }
  0x12   : > { %s2414_s11 = scalar_select %p2004_p5, 1, 0 }
  0x13   : > { %s2415_s12 = scalar_select %p2010_p6, 1, 0 }
  0x14   : > { %p201_p8 = scmp.eq.s32.totalorder %s1376_s29, 1  ;;  %p1377_p9 = scmp.ge.s32.totalorder %s1909_s27, 1 }
  0x15   : > { %p208_p10 = scmp.lt.s32.totalorder %s1909_s27, 3  ;;  %p2017_p11 = por %p195_p7, %p39_p0 }
  0x16   : > { %p2021_p12 = por %p201_p8, %p45_p3  ;;  %s1911_s16 = smov [#allocation5]  }
  0x17   : > { %s2416_s13 = scalar_select %p2017_p11, 1, 0 }
  0x18   : > { %s2417_s14 = scalar_select %p2021_p12, 1, 0 }
  0x19   : > { %p2025_p13 = pnand %p1377_p9, %p208_p10  ;;  %s220_s17 = sshll.u32 %s1911_s16, 4  ;;  %s221_s17 = int_to_ptr.vmem [resolvable:$true] %s220_s17 }
  0x1a   : > { %2418 = sst [smem:[#allocation18_spill]] %s2417_s14  ;;  %s1912_s19 = smov [#allocation7]  }
  0x1b   : > { %s2419_s15 = scalar_select %p2025_p13, 1, 0 }
  0x1c   : > { %p1563_p1 = pneg %p2025_p13  ;;  %s236_s20 = sshll.u32 %s1912_s19, 4  ;;  %s2037_s20 = int_to_ptr.vmem [resolvable:$true] %s236_s20 }
  0x1d   : > { %s2421_s1 = sld [smem:[#allocation19_spill]] }
  0x1e   : > { %p2033_p2 = pnand %p1563_p1, %p2403_p4 }
  0x20   : > { %p2047_p3 = pneg %p2033_p2 }
  0x23   : > { %s1723_s23 = scalar_lea.hbm %s2421_s1, 2048 }
  0x24   : > { %p1724_p0 = scmp.ne.s32.totalorder %s2421_s1, %s1723_s23  ;;  %p1730_p9 = scmp.lt.u32.totalorder %s1723_s23, %s2421_s1 }
  0x26   : > { %p1726_p7 = pnand %p2047_p3, %p1724_p0 }
  0x28   : > { %p1727_p8 = pneg %p1726_p7 }
  0x2a   : > { %p1732_p10 = pnand %p1730_p9, %p1727_p8 }
  0x2c   : > { %1735 = shalt.err (!%p1732_p10)
}
  0x2d   : > { %s1736_s21 = scalar_lea.vmem %s221_s17, 2048  ;;  %p1744_p11 = scmp.lt.s32.totalorder %s221_s17, %s221_s17 }
  0x2e   : > { %p1737_p1 = scmp.ne.s32.totalorder %s221_s17, %s1736_s21  ;;  %p1745_p6 = scmp.lt.s32.totalorder %s1736_s21, %s1736_s21 }
  0x30   : > { %p1739_p4 = pnand %p1737_p1, %p2047_p3  ;;  %p1746_p13 = por %p1745_p6, %p1744_p11 }
  0x32   : > { %p1740_p12 = pneg %p1739_p4 }
  0x34   : > { %p1747_p5 = pnand %p1746_p13, %p1740_p12 }
  0x36   : > { %1750 = shalt.err (!%p1747_p5)
}
  0x37   : > { %s1913_s22 = smov 128   ;;  %s1914_s29 = smov 8  }
  0x38   : > { %1566 = dma.hbm_to_vmem [thread:$0]  (!%p2033_p2), %s2421_s1, 2048, %s221_s17, [#allocation6], %s1913_s22, %s1913_s22, %s1914_s29  }
  0x39   : > { %s1751_s10 = scalar_lea.hbm %s2398_s3, 4096 }
  0x3a   : > { %p1752_p4 = scmp.ne.s32.totalorder %s2398_s3, %s1751_s10  ;;  %p1758_p11 = scmp.lt.u32.totalorder %s1751_s10, %s2398_s3 }
  0x3c   : > { %p1754_p6 = pnand %p1752_p4, %p2047_p3 }
  0x3e   : > { %p1755_p5 = pneg %p1754_p6 }
  0x40   : > { %p1760_p12 = pnand %p1758_p11, %p1755_p5 }
  0x42   : > { %1763 = shalt.err (!%p1760_p12)
}
  0x43   : > { %s1764_s17 = scalar_lea.vmem %s2037_s20, 4096  ;;  %p1772_p8 = scmp.lt.s32.totalorder %s2037_s20, %s2037_s20 }
  0x44   : > { %p1765_p13 = scmp.ne.s32.totalorder %s2037_s20, %s1764_s17  ;;  %p1773_p9 = scmp.lt.s32.totalorder %s1764_s17, %s1764_s17 }
  0x46   : > { %p1767_p0 = pnand %p1765_p13, %p2047_p3  ;;  %p1774_p10 = por %p1773_p9, %p1772_p8 }
  0x48   : > { %p1768_p7 = pneg %p1767_p0 }
  0x4a   : > { %p1775_p1 = pnand %p1774_p10, %p1768_p7 }
  0x4c   : > { %1778 = shalt.err (!%p1775_p1)
}
  0x4d   : > { %1569 = dma.hbm_to_vmem [thread:$0]  (!%p2033_p2), %s2398_s3, 4096, %s2037_s20, [#allocation6], %s1913_s22, %s1913_s22, %s1914_s29  }
  0x4e   : > { %s1915_s10 = smov [#allocation8]   ;;  %s1779_s16 = scalar_lea.hbm %s2400_s5, 2048 }
  0x4f   : > { %s252_s14 = sshll.u32 %s1915_s10, 4  ;;  %p1780_p4 = scmp.ne.s32.totalorder %s2400_s5, %s1779_s16  ;;  %s253_s14 = int_to_ptr.vmem [resolvable:$true] %s252_s14 }
  0x50   : > { %p1786_p11 = scmp.lt.u32.totalorder %s1779_s16, %s2400_s5 }
  0x51   : > { %p1782_p6 = pnand %p1780_p4, %p2047_p3 }
  0x53   : > { %p1783_p5 = pneg %p1782_p6 }
  0x55   : > { %p1788_p12 = pnand %p1786_p11, %p1783_p5 }
  0x57   : > { %1791 = shalt.err (!%p1788_p12)
}
  0x58   : > { %s1792_s20 = scalar_lea.vmem %s253_s14, 2048  ;;  %p1800_p8 = scmp.lt.s32.totalorder %s253_s14, %s253_s14 }
  0x59   : > { %p1793_p13 = scmp.ne.s32.totalorder %s253_s14, %s1792_s20  ;;  %p1801_p9 = scmp.lt.s32.totalorder %s1792_s20, %s1792_s20 }
  0x5b   : > { %p1795_p0 = pnand %p1793_p13, %p2047_p3  ;;  %p1802_p10 = por %p1801_p9, %p1800_p8 }
  0x5d   : > { %p1796_p7 = pneg %p1795_p0 }
  0x5f   : > { %p1803_p1 = pnand %p1802_p10, %p1796_p7 }
  0x61   : > { %1806 = shalt.err (!%p1803_p1)
}
  0x62   : > { %s1916_s22 = smov 64   ;;  %s1917_s29 = smov 4  }
  0x63   : > { %1572 = dma.hbm_to_vmem [thread:$0]  (!%p2033_p2), %s2400_s5, 2048, %s253_s14, [#allocation9], %s1916_s22, %s1916_s22, %s1917_s29  }
  0x64   : > { %p1381_p4 = scmp.ge.s32.totalorder %s1909_s27, 2 }
  0x65   : > { %p2423_p3 = scmp.ne.s32.totalorder (!%p1381_p4), %s2414_s11, 0 }
  0x66   : > { %265 = sbr.rel (%p1381_p4) target bundleno = 144 (0x90), region = 40 }
  0x6d   : > { %268 = sbr.rel (!%p2423_p3) target bundleno = 144 (0x90), region = 44  ;;  %s269_s9 = sand.u32 (%p2423_p3), 1, %s1905_s26  }
  0x6e   : > { %s274_s30 = smul.u32 (%p2423_p3), 14, %s1909_s27  ;;  %s2114_s23 = scalar_lea.sflag (%p2423_p3), [#allocation3], %s269_s9 }
  0x6f   : > { %s1546_s10 = smul.u32 (%p2423_p3), 56, %s269_s9 }
  0x70   : > { %s275_s8 = ssub.s32 (%p2423_p3), 25, %s274_s30 }
  0x71   : > { %p276_p6 = scmp.lt.s32.totalorder (%p2423_p3), %s275_s8, 14  ;;  %s273_s16 = scalar_lea.vmem (%p2423_p3), [#allocation2], %s1546_s10 }
  0x74   : > { %s2440_s8 = smov (!%p276_p6, %s275_s8), 14 }
  0x75   : > { %s2111_s18 = sshll.u32 %s2440_s8, 6 }
  0x76   : > { %s280_s14 = ssub.s32 896, %s2111_s18 }
  0x77   : > { %281 = vsyncadd %s2114_s23, %s280_s14  ;;  %p1383_p2 = scmp.ne.s32.totalorder %s2111_s18, 0  ;;  %s1470_s11 = smul.u32 896, %s1909_s27 }
  0x78   : > { %s286_s19 = sshll.u32 %s273_s16, 4  ;;  %s1811_s1 = scalar_lea.hbm %s2395_s0, 1600  ;;  %s2124_s19 = int_to_ptr.vmem [resolvable:$true] %s286_s19 }
  0x79   : > { %s2122_s20 = scalar_lea.hbm %s2395_s0, %s1470_s11 }
  0x7a   : > { %s1807_s22 = scalar_lea.hbm %s2122_s20, %s2111_s18  ;;  %p1812_p13 = scmp.lt.u32.totalorder %s2122_s20, %s2395_s0 }
  0x7b   : > { %p1808_p5 = scmp.ne.s32.totalorder %s2122_s20, %s1807_s22  ;;  %p1813_p0 = scmp.lt.u32.totalorder %s1811_s1, %s1807_s22 }
  0x7c   : > { %p1815_p8 = scmp.lt.u32.totalorder %s1807_s22, %s2122_s20 }
  0x7d   : > { %p1809_p11 = pnand %p1808_p5, %p1383_p2  ;;  %p1814_p7 = por %p1813_p0, %p1812_p13 }
  0x7f   : > { %p1810_p12 = pneg %p1809_p11  ;;  %p1816_p9 = por %p1815_p8, %p1814_p7 }
  0x81   : > { %p1817_p10 = pnand %p1816_p9, %p1810_p12 }
  0x83   : > { %1820 = shalt.err (!%p1817_p10)
}
  0x84   : > { %s1821_s10 = scalar_lea.vmem %s2124_s19, %s2111_s18  ;;  %s1918_s8 = smov [#allocation2]  }
  0x85   : > { %p1822_p1 = scmp.ne.s32.totalorder %s2124_s19, %s1821_s10  ;;  %s1825_s14 = sshll.u32 %s1918_s8, 4  ;;  %s1826_s14 = int_to_ptr.vmem [resolvable:$false] %s1825_s14 }
  0x86   : > { %s1827_s16 = scalar_lea.vmem %s1826_s14, 1792  ;;  %p1828_p5 = scmp.lt.s32.totalorder %s2124_s19, %s1826_s14 }
  0x87   : > { %p1823_p3 = pnand %p1822_p1, %p1383_p2  ;;  %p1829_p11 = scmp.lt.s32.totalorder %s1827_s16, %s1821_s10 }
  0x89   : > { %p1824_p6 = pneg %p1823_p3  ;;  %p1830_p13 = por %p1829_p11, %p1828_p5 }
  0x8b   : > { %p1831_p0 = pnand %p1830_p13, %p1824_p6 }
  0x8d   : > { %1834 = shalt.err (!%p1831_p0)
}
  0x8e   : > { %s1919_s11 = smov 64   ;;  %s1920_s21 = smov 4  }
  0x8f   : > { %292 = dma.hbm_to_vmem [thread:$0]  (%p1383_p2), %s2122_s20, %s2111_s18, %s2124_s19, %s2114_s23, %s1919_s11, %s1919_s11, %s1920_s21  }
  0x90 PF: > { %p2424_p12 = scmp.ne.s32.totalorder %s2419_s15, 0 }
  0x91   : > { %s2154_s17 = sand.u32 (!%p2424_p12), 1, %s1901_s25   ;;  %p2425_p7 = scmp.ne.s32.totalorder (!%p2424_p12), %s2415_s12, 0 }
  0x92   : > { %298 = sbr.rel (%p2424_p12) target bundleno = 933 (0x3a5), region = 48  ;;  %s301_s29 = scalar_lea.sflag (!%p2424_p12), [#allocation3], %s2154_s17 }
  0x93   : > { %s1547_s22 = smul.u32 (!%p2424_p12), 56, %s2154_s17 }
  0x95   : > { %s2158_s24 = scalar_lea.vmem (!%p2424_p12), [#allocation2], %s1547_s22 }
  0x99   : > { %1880 = dma.done.wait (%p2425_p7), %s301_s29, 896  }
  0x9a   : > { %1882 = vsyncadd (%p2425_p7), %s301_s29, 4294966400  ;;  %p2426_p2 = scmp.eq.s32.totalorder %s1986_s28, 0 }
  0x9c   : > { %1884 = dma.done.wait (%p2426_p2), [#allocation6], 6144   ;;  %p2427_p8 = pmov %p2426_p2 }
  0x9d   : > { %p2428_p9 = pmov %p2426_p2 }
  0x9e   : > { %1886 = vsyncadd (%p2427_p8), [#allocation6], 4294961152 }
  0x9f   : > { %1888 = dma.done.wait (%p2428_p9), [#allocation9], 2048   ;;  %p2429_p10 = pmov %p2426_p2 }
  0xa0   : > { %v1921_v0 = vmov 0   ;;  %v1628_v1 = vld [vmem:[#allocation5 + $0x4] ss:$8 sps:$4 sm:$0xff]   ;;  %v1630_v2 = vld [vmem:[#allocation5] ss:$8 sps:$4 sm:$0xff]   ;;  %v1653_v30 = vld [vmem:[%s2158_s24 + $0x8] sm:$0xff]  }
  0xa1   : > { %1890 = vsyncadd (%p2429_p10), [#allocation9], 4294965248  ;;  %554 = vmatprep.mubr.bf16.mxu0 %v1921_v0  ;;  %522 = vmatprep.subr.bf16.mxu0 %v1628_v1  ;;  %v1631_v3 = vld [vmem:[#allocation5 + $0x14] ss:$8 sps:$4 sm:$0xff]   ;;  %v1633_v4 = vld [vmem:[#allocation5 + $0x10] ss:$8 sps:$4 sm:$0xff]  }
  0xa2   : > { %523 = vmatpush1.bf16.msra.mxu0 %v1630_v2  ;;  %v1634_v5 = vld [vmem:[#allocation5 + $0x24] ss:$8 sps:$4 sm:$0xff]   ;;  %v1636_v6 = vld [vmem:[#allocation5 + $0x20] ss:$8 sps:$4 sm:$0xff]   ;;  %v1637_v7 = vld [vmem:[#allocation5 + $0x34] ss:$8 sps:$4 sm:$0xff]  }
  0xa3   : > { %524 = vmatprep.subr.bf16.mxu0 %v1631_v3  ;;  %v1639_v8 = vld [vmem:[#allocation5 + $0x30] ss:$8 sps:$4 sm:$0xff]   ;;  %v1640_v9 = vld [vmem:[#allocation5 + $0x44] ss:$8 sps:$4 sm:$0xff]   ;;  %v1642_v10 = vld [vmem:[#allocation5 + $0x40] ss:$8 sps:$4 sm:$0xff]  }
  0xa4   : > { %v1643_v11 = vld [vmem:[#allocation5 + $0x54] ss:$8 sps:$4 sm:$0xff]   ;;  %v1645_v12 = vld [vmem:[#allocation5 + $0x50] ss:$8 sps:$4 sm:$0xff]   ;;  %v1659_v13 = vld [vmem:[#allocation7 + $0x4] ss:$8 sps:$4 sm:$0xff]  }
  0xa5   : > { %v1661_v14 = vld [vmem:[#allocation7] ss:$8 sps:$4 sm:$0xff]   ;;  %v1662_v15 = vld [vmem:[#allocation7 + $0x14] ss:$8 sps:$4 sm:$0xff]   ;;  %v1646_v16 = vld [vmem:[#allocation5 + $0x64] ss:$8 sps:$4 sm:$0xff]   ;;  %871 = vmatprep.subr.bf16.mxu1 %v1659_v13 }
  0xa6   : > { %525 = vmatpush1.bf16.msra.mxu0 %v1633_v4  ;;  %872 = vmatpush1.bf16.msra.mxu1 %v1661_v14  ;;  %v1664_v17 = vld [vmem:[#allocation7 + $0x10] ss:$8 sps:$4 sm:$0xff]   ;;  %v1665_v18 = vld [vmem:[#allocation7 + $0x24] ss:$8 sps:$4 sm:$0xff]   ;;  %v1648_v19 = vld [vmem:[#allocation5 + $0x60] ss:$8 sps:$4 sm:$0xff]   ;;  %v390_v4 = vlaneseq }
  0xa7   : > { %526 = vmatprep.subr.bf16.mxu0 %v1634_v5  ;;  %873 = vmatprep.subr.bf16.mxu1 %v1662_v15  ;;  %v1649_v20 = vld [vmem:[#allocation5 + $0x74] ss:$8 sps:$4 sm:$0xff]   ;;  %v1667_v21 = vld [vmem:[#allocation7 + $0x20] ss:$8 sps:$4 sm:$0xff]   ;;  %v1651_v23 = vld [vmem:[#allocation5 + $0x70] ss:$8 sps:$4 sm:$0xff]  }
  0xa8   : > { %v1668_v22 = vld [vmem:[#allocation7 + $0x34] ss:$8 sps:$4 sm:$0xff]   ;;  %v1670_v24 = vld [vmem:[#allocation7 + $0x30] ss:$8 sps:$4 sm:$0xff]   ;;  %v1671_v26 = vld [vmem:[#allocation7 + $0x44] ss:$8 sps:$4 sm:$0xff]  }
  0xa9   : > { %v1652_v25 = vld [vmem:[%s2158_s24] sm:$0xff]   ;;  %v1654_v35 = vld [vmem:[%s2158_s24 + $0x10] sm:$0xff]   ;;  %v1655_v40 = vld [vmem:[%s2158_s24 + $0x18] sm:$0xff]   ;;  %v2207_v5 = vshrl.u32 %v390_v4, 7  ;;  %s1548_s19 = smul.u32 112, %s2154_s17  ;;  %s1255_s30 = scalar_lea.sflag [#allocation4], %s2154_s17 }
  0xaa   : > { %527 = vmatpush1.bf16.msra.mxu0 %v1636_v6  ;;  %874 = vmatpush1.bf16.msra.mxu1 %v1664_v17  ;;  %v1673_v27 = vld [vmem:[#allocation7 + $0x40] ss:$8 sps:$4 sm:$0xff]   ;;  %v1674_v28 = vld [vmem:[#allocation7 + $0x54] ss:$8 sps:$4 sm:$0xff]   ;;  %v1676_v29 = vld [vmem:[#allocation7 + $0x50] ss:$8 sps:$4 sm:$0xff]  }
  0xab   : > { %528 = vmatprep.subr.bf16.mxu0 %v1637_v7  ;;  %875 = vmatprep.subr.bf16.mxu1 %v1665_v18  ;;  %v1677_v31 = vld [vmem:[#allocation7 + $0x64] ss:$8 sps:$4 sm:$0xff]   ;;  %v1679_v32 = vld [vmem:[#allocation7 + $0x60] ss:$8 sps:$4 sm:$0xff]   ;;  %v1680_v33 = vld [vmem:[#allocation7 + $0x74] ss:$8 sps:$4 sm:$0xff]  }
  0xac   : > { %v1682_v34 = vld [vmem:[#allocation7 + $0x70] ss:$8 sps:$4 sm:$0xff]   ;;  %v1683_v36 = vld [vmem:[#allocation7 + $0x84] ss:$8 sps:$4 sm:$0xff]   ;;  %v1685_v37 = vld [vmem:[#allocation7 + $0x80] ss:$8 sps:$4 sm:$0xff]  }
  0xad   : > { %v1686_v38 = vld [vmem:[#allocation7 + $0x94] ss:$8 sps:$4 sm:$0xff]   ;;  %v1688_v39 = vld [vmem:[#allocation7 + $0x90] ss:$8 sps:$4 sm:$0xff]   ;;  %v1689_v41 = vld [vmem:[#allocation7 + $0xa4] ss:$8 sps:$4 sm:$0xff]  }
  0xae   : > { %529 = vmatpush1.bf16.msra.mxu0 %v1639_v8  ;;  %876 = vmatpush1.bf16.msra.mxu1 %v1667_v21  ;;  %v1691_v42 = vld [vmem:[#allocation7 + $0xa0] ss:$8 sps:$4 sm:$0xff]   ;;  %v1692_v43 = vld [vmem:[#allocation7 + $0xb4] ss:$8 sps:$4 sm:$0xff]   ;;  %v1694_v44 = vld [vmem:[#allocation7 + $0xb0] ss:$8 sps:$4 sm:$0xff]  }
  0xaf   : > { %530 = vmatprep.subr.bf16.mxu0 %v1640_v9  ;;  %877 = vmatprep.subr.bf16.mxu1 %v1668_v22  ;;  %v1656_v45 = vld [vmem:[%s2158_s24 + $0x20] sm:$0xff]   ;;  %v1657_v49 = vld [vmem:[%s2158_s24 + $0x28] sm:$0xff]   ;;  %v1658_v50 = vld [vmem:[%s2158_s24 + $0x30] sm:$0xff]   ;;  %v392_v6 = vsub.s32 0, %v2207_v5  ;;  %v396_v8 = vsub.s32 1, %v2207_v5  ;;  %s2303_s9 = scalar_lea.vmem [#allocation10], %s1548_s19 }
  0xb0   : > { %v1695_v46 = vld [vmem:[#allocation7 + $0xc4] ss:$8 sps:$4 sm:$0xff]   ;;  %v1697_v47 = vld [vmem:[#allocation7 + $0xc0] ss:$8 sps:$4 sm:$0xff]   ;;  %v1698_v48 = vld [vmem:[#allocation7 + $0xd4] ss:$8 sps:$4 sm:$0xff]  }
  0xb1   : > { %v1700_v51 = vld [vmem:[#allocation7 + $0xd0] ss:$8 sps:$4 sm:$0xff]   ;;  %v1701_v52 = vld [vmem:[#allocation7 + $0xe4] ss:$8 sps:$4 sm:$0xff]   ;;  %v1703_v53 = vld [vmem:[#allocation7 + $0xe0] ss:$8 sps:$4 sm:$0xff]  }
  0xb2   : > { %531 = vmatpush1.bf16.msra.mxu0 %v1642_v10  ;;  %878 = vmatpush1.bf16.msra.mxu1 %v1670_v24  ;;  %v1704_v54 = vld [vmem:[#allocation7 + $0xf4] ss:$8 sps:$4 sm:$0xff]   ;;  %v1706_v55 = vld [vmem:[#allocation7 + $0xf0] ss:$8 sps:$4 sm:$0xff]   ;;  %v1707_v56 = vld [vmem:[#allocation8 + $0x40] sm:$0xff]   ;;  %p2430_p1 = scmp.ne.s32.totalorder %s2416_s13, 0 }
  0xb3   : > { %532 = vmatprep.subr.bf16.mxu0 %v1643_v11  ;;  %879 = vmatprep.subr.bf16.mxu1 %v1671_v26  ;;  %v1708_v57 = vld [vmem:[#allocation8] sm:$0xff]   ;;  %v1709_v58 = vld [vmem:[#allocation8 + $0x48] sm:$0xff]   ;;  %v1711_v60 = vld [vmem:[#allocation8 + $0x50] sm:$0xff]   ;;  %s1262_s10 = smul.u32 (%p2430_p1), 14, %s1986_s28 }
  0xb4   : > { %v1710_v59 = vld [vmem:[#allocation8 + $0x8] sm:$0xff]   ;;  %v2186_v61 = vld [vmem:[#allocation8 + $0x10] sm:$0xff]   ;;  %v2188_v62 = vld [vmem:[#allocation8 + $0x58] sm:$0xff]  }
  0xb5   : > { %v2191_v63 = vld [vmem:[#allocation8 + $0x18] sm:$0xff]   ;;  %v2197_v1 = vld [vmem:[#allocation8 + $0x20] sm:$0xff]   ;;  %v2200_v2 = vld [vmem:[#allocation8 + $0x68] sm:$0xff]   ;;  %s1263_s8 = ssub.s32 (%p2430_p1), 25, %s1262_s10 }
  0xb6   : > { %533 = vmatpush1.bf16.msra.mxu0 %v1645_v12  ;;  %880 = vmatpush1.bf16.msra.mxu1 %v1673_v27  ;;  %v2203_v3 = vld [vmem:[#allocation8 + $0x28] sm:$0xff]   ;;  %v388_v7 = vld [vmem:[%s2397_s2] sm:$0x3]  ;;  %p1264_p3 = scmp.lt.s32.totalorder (%p2430_p1), %s1263_s8, 14 }
  0xb7   : > { %534 = vmatprep.subr.bf16.mxu0 %v1646_v16  ;;  %881 = vmatprep.subr.bf16.mxu1 %v1674_v28  ;;  %v2216_v9 = vrot.slane %v388_v7, %v392_v6  ;;  %v2220_v10 = vrot.slane %v388_v7, %v396_v8 }
  0xba   : > { %535 = vmatpush1.bf16.msra.mxu0 %v1648_v19  ;;  %882 = vmatpush1.bf16.msra.mxu1 %v1676_v29 }
  0xbb   : > { %536 = vmatprep.subr.bf16.mxu0 %v1649_v20  ;;  %883 = vmatprep.subr.bf16.mxu1 %v1677_v31 }
  0xbe   : > { %537 = vmatpush1.bf16.msra.mxu0 %v1651_v23  ;;  %884 = vmatpush1.bf16.msra.mxu1 %v1679_v32 }
  0xbf   : > { %885 = vmatprep.subr.bf16.mxu1 %v1680_v33  ;;  %1472 = vmatprep.subr.bf16.mxu0 %v1707_v56 }
  0xc1   : > { %555 = vmatmul.mubr.bf16.vlgmr.msra.gmra.mrb[0].mxu0 %v1652_v25 }
  0xc2   : > { %564 = vmatprep.mubr.bf16.mxu0 %v1921_v0  ;;  %886 = vmatpush1.bf16.msra.mxu1 %v1682_v34 }
  0xc3   : > { %887 = vmatprep.subr.bf16.mxu1 %v1683_v36  ;;  %1473 = vmatpush3.bf16.msra.mxu0 %v1708_v57 }
  0xc4   : > { %1474 = vmatprep.subr.bf16.mxu0 %v1709_v58 }
  0xc6   : > { %888 = vmatpush1.bf16.msra.mxu1 %v1685_v37 }
  0xc7   : > { %889 = vmatprep.subr.bf16.mxu1 %v1686_v38  ;;  %1475 = vmatpush3.bf16.msra.mxu0 %v1710_v59 }
  0xc8   : > { %1476 = vmatprep.subr.bf16.mxu0 %v1711_v60 }
  0xc9   : > { %565 = vmatmul.mubr.bf16.gmra.mrb[4].mxu0 %v1653_v30 }
  0xca   : > { %574 = vmatprep.mubr.bf16.mxu0 %v1921_v0  ;;  %890 = vmatpush1.bf16.msra.mxu1 %v1688_v39 }
  0xcb   : > { %891 = vmatprep.subr.bf16.mxu1 %v1689_v41  ;;  %1477 = vmatpush3.bf16.msra.mxu0 %v2186_v61 }
  0xcc   : > { %1478 = vmatprep.subr.bf16.mxu0 %v2188_v62 }
  0xce   : > { %892 = vmatpush1.bf16.msra.mxu1 %v1691_v42 }
  0xcf   : > { %893 = vmatprep.subr.bf16.mxu1 %v1692_v43  ;;  %1479 = vmatpush3.bf16.msra.mxu0 %v2191_v63 }
  0xd1   : > { %575 = vmatmul.mubr.bf16.gmra.mrb[8].mxu0 %v1654_v35 }
  0xd2   : > { %584 = vmatprep.mubr.bf16.mxu0 %v1921_v0  ;;  %894 = vmatpush1.bf16.msra.mxu1 %v1694_v44 }
  0xd3   : > { %895 = vmatprep.subr.bf16.mxu1 %v1695_v46 }
  0xd6   : > { %896 = vmatpush1.bf16.msra.mxu1 %v1697_v47 }
  0xd7   : > { %897 = vmatprep.subr.bf16.mxu1 %v1698_v48 }
  0xd9   : > { %585 = vmatmul.mubr.bf16.gmra.mrb[12].mxu0 %v1655_v40 }
  0xda   : > { %594 = vmatprep.mubr.bf16.mxu0 %v1921_v0  ;;  %898 = vmatpush1.bf16.msra.mxu1 %v1700_v51 }
  0xdb   : > { %899 = vmatprep.subr.bf16.mxu1 %v1701_v52 }
  0xde   : > { %900 = vmatpush1.bf16.msra.mxu1 %v1703_v53 }
  0xdf   : > { %901 = vmatprep.subr.bf16.mxu1 %v1704_v54 }
  0xe1   : > { %595 = vmatmul.mubr.bf16.gmra.mrb[16].mxu0 %v1656_v45 }
  0xe2   : > { %604 = vmatprep.mubr.bf16.mxu0 %v1921_v0  ;;  %902 = vmatpush1.bf16.msra.mxu1 %v1706_v55 }
  0xe3   : > { %1530 = vmatprep.subr.bf16.mxu1 %v1707_v56 }
  0xe9   : > { %605 = vmatmul.mubr.bf16.gmra.mrb[20].mxu0 %v1657_v49 }
  0xea   : > { %614 = vmatprep.mubr.bf16.mxu0 %v1921_v0  ;;  %v2194_v0 = vld [vmem:[#allocation8 + $0x60] sm:$0xff]  }
  0xeb   : > { %1480 = vmatprep.subr.bf16.mxu0 %v2194_v0 }
  0xec   : > { %1481 = vmatpush3.bf16.msra.mxu0 %v2197_v1 }
  0xed   : > { %1482 = vmatprep.subr.bf16.mxu0 %v2200_v2 }
  0xf0   : > { %1483 = vmatpush3.bf16.msra.mxu0 %v2203_v3 }
  0xf1   : > { %615 = vmatmul.mubr.bf16.gmra.mrb[24].mxu0 %v1658_v50 }
 0x194   : > { %v556_v11 = vpop.f32.mrb[0].mxu0 }
 0x195   : > { %v557_v12 = vadd.f32 %v556_v11, %v2216_v9  ;;  %v558_v13 = vpop.f32.mrb[1].mxu0 }
 0x196   : > { %v559_v14 = vadd.f32 %v558_v13, %v2220_v10  ;;  %v560_v15 = vpop.f32.mrb[2].mxu0 }
 0x197   : > { %v561_v16 = vadd.f32 %v560_v15, %v2216_v9  ;;  %v562_v17 = vpop.f32.mrb[3].mxu0  ;;  %v625_v19 = vmax.f32 %v557_v12, 0.0 }
 0x198   : > { %v563_v18 = vadd.f32 %v562_v17, %v2220_v10  ;;  %v626_v21 = vmax.f32 %v559_v14, 0.0 }
 0x199   : > { %v627_v20 = vmax.f32 %v561_v16, 0.0 }
 0x19a   : > { %v628_v22 = vmax.f32 %v563_v18, 0.0 }
 0x19b   : > { %v653_v23 = vpack.c.bf16 %v627_v20, %v625_v19 }
 0x19c   : > { %v566_v24 = vpop.f32.mrb[4].mxu0  ;;  %v654_v25 = vpack.c.bf16 %v628_v22, %v626_v21 }
 0x19d   : > { %v567_v26 = vadd.f32 %v566_v24, %v2216_v9  ;;  %v568_v27 = vpop.f32.mrb[5].mxu0 }
 0x19e   : > { %v569_v28 = vadd.f32 %v568_v27, %v2220_v10  ;;  %v570_v29 = vpop.f32.mrb[6].mxu0  ;;  %903 = vmatprep.mubr.bf16.mxu1 %v654_v25 }
 0x19f   : > { %v571_v30 = vadd.f32 %v570_v29, %v2216_v9  ;;  %v572_v31 = vpop.f32.mrb[7].mxu0  ;;  %904 = vmatmul.mubr.bf16.vlgmr.msra.gmra.mrb[0].mxu1 %v653_v23  ;;  %v629_v33 = vmax.f32 %v567_v26, 0.0 }
 0x1a0   : > { %v573_v32 = vadd.f32 %v572_v31, %v2220_v10  ;;  %1538 = vmatpush3.bf16.msra.mxu1 %v1708_v57  ;;  %v630_v35 = vmax.f32 %v569_v28, 0.0 }
 0x1a1   : > { %v631_v34 = vmax.f32 %v571_v30, 0.0  ;;  %1531 = vmatprep.subr.bf16.mxu1 %v1709_v58 }
 0x1a2   : > { %v632_v36 = vmax.f32 %v573_v32, 0.0 }
 0x1a3   : > { %v655_v37 = vpack.c.bf16 %v631_v34, %v629_v33 }
 0x1a4   : > { %v656_v38 = vpack.c.bf16 %v632_v36, %v630_v35  ;;  %v576_v39 = vpop.f32.mrb[8].mxu0  ;;  %1539 = vmatpush3.bf16.msra.mxu1 %v1710_v59 }
 0x1a5   : > { %v577_v40 = vadd.f32 %v576_v39, %v2216_v9  ;;  %v578_v41 = vpop.f32.mrb[9].mxu0  ;;  %1532 = vmatprep.subr.bf16.mxu1 %v1711_v60 }
 0x1a6   : > { %v579_v42 = vadd.f32 %v578_v41, %v2220_v10  ;;  %v580_v43 = vpop.f32.mrb[10].mxu0  ;;  %913 = vmatprep.mubr.bf16.mxu1 %v656_v38 }
 0x1a7   : > { %v581_v44 = vadd.f32 %v580_v43, %v2216_v9  ;;  %v582_v45 = vpop.f32.mrb[11].mxu0  ;;  %914 = vmatmul.mubr.bf16.gmra.mrb[4].mxu1 %v655_v37  ;;  %v633_v47 = vmax.f32 %v577_v40, 0.0 }
 0x1a8   : > { %v583_v46 = vadd.f32 %v582_v45, %v2220_v10  ;;  %1540 = vmatpush3.bf16.msra.mxu1 %v2186_v61  ;;  %v634_v49 = vmax.f32 %v579_v42, 0.0 }
 0x1a9   : > { %v635_v48 = vmax.f32 %v581_v44, 0.0  ;;  %1533 = vmatprep.subr.bf16.mxu1 %v2188_v62 }
 0x1aa   : > { %v636_v50 = vmax.f32 %v583_v46, 0.0 }
 0x1ab   : > { %v657_v51 = vpack.c.bf16 %v635_v48, %v633_v47 }
 0x1ac   : > { %v658_v52 = vpack.c.bf16 %v636_v50, %v634_v49  ;;  %v586_v53 = vpop.f32.mrb[12].mxu0  ;;  %1541 = vmatpush3.bf16.msra.mxu1 %v2191_v63  ;;  %v1719_v50 = vld [vmem:[#allocation8 + $0x70] sm:$0xff]  }
 0x1ad   : > { %v587_v54 = vadd.f32 %v586_v53, %v2216_v9  ;;  %v588_v55 = vpop.f32.mrb[13].mxu0  ;;  %1534 = vmatprep.subr.bf16.mxu1 %v2194_v0  ;;  %1484 = vmatprep.subr.bf16.mxu0 %v1719_v50 }
 0x1ae   : > { %v589_v56 = vadd.f32 %v588_v55, %v2220_v10  ;;  %v590_v57 = vpop.f32.mrb[14].mxu0  ;;  %923 = vmatprep.mubr.bf16.mxu1 %v658_v52  ;;  %v1721_v52 = vld [vmem:[#allocation8 + $0x78] sm:$0xff]  }
 0x1af   : > { %v591_v58 = vadd.f32 %v590_v57, %v2216_v9  ;;  %v592_v59 = vpop.f32.mrb[15].mxu0  ;;  %924 = vmatmul.mubr.bf16.gmra.mrb[8].mxu1 %v657_v51  ;;  %v637_v61 = vmax.f32 %v587_v54, 0.0  ;;  %v1720_v51 = vld [vmem:[#allocation8 + $0x30] sm:$0xff]  }
 0x1b0   : > { %v593_v60 = vadd.f32 %v592_v59, %v2220_v10  ;;  %1542 = vmatpush3.bf16.msra.mxu1 %v2197_v1  ;;  %v638_v63 = vmax.f32 %v589_v56, 0.0  ;;  %1485 = vmatpush3.bf16.msra.mxu0 %v1720_v51 }
 0x1b1   : > { %v639_v62 = vmax.f32 %v591_v58, 0.0  ;;  %1535 = vmatprep.subr.bf16.mxu1 %v2200_v2  ;;  %1486 = vmatprep.subr.bf16.mxu0 %v1721_v52 }
 0x1b2   : > { %v640_v4 = vmax.f32 %v593_v60, 0.0 }
 0x1b3   : > { %v659_v7 = vpack.c.bf16 %v639_v62, %v637_v61 }
 0x1b4   : > { %v660_v0 = vpack.c.bf16 %v640_v4, %v638_v63  ;;  %v596_v11 = vpop.f32.mrb[16].mxu0  ;;  %1543 = vmatpush3.bf16.msra.mxu1 %v2203_v3 }
 0x1b5   : > { %v597_v12 = vadd.f32 %v596_v11, %v2216_v9  ;;  %v598_v13 = vpop.f32.mrb[17].mxu0  ;;  %1536 = vmatprep.subr.bf16.mxu1 %v1719_v50 }
 0x1b6   : > { %v599_v14 = vadd.f32 %v598_v13, %v2220_v10  ;;  %v600_v15 = vpop.f32.mrb[18].mxu0  ;;  %933 = vmatprep.mubr.bf16.mxu1 %v660_v0 }
 0x1b7   : > { %v601_v1 = vadd.f32 %v600_v15, %v2216_v9  ;;  %v602_v16 = vpop.f32.mrb[19].mxu0  ;;  %934 = vmatmul.mubr.bf16.gmra.mrb[12].mxu1 %v659_v7  ;;  %v641_v17 = vmax.f32 %v597_v12, 0.0 }
 0x1b8   : > { %v603_v2 = vadd.f32 %v602_v16, %v2220_v10  ;;  %v642_v19 = vmax.f32 %v599_v14, 0.0  ;;  %1544 = vmatpush3.bf16.msra.mxu1 %v1720_v51 }
 0x1b9   : > { %v643_v18 = vmax.f32 %v601_v1, 0.0  ;;  %1537 = vmatprep.subr.bf16.mxu1 %v1721_v52 }
 0x1ba   : > { %v644_v20 = vmax.f32 %v603_v2, 0.0 }
 0x1bb   : > { %v661_v21 = vpack.c.bf16 %v643_v18, %v641_v17 }
 0x1bc   : > { %v662_v22 = vpack.c.bf16 %v644_v20, %v642_v19  ;;  %v606_v3 = vpop.f32.mrb[20].mxu0 }
 0x1bd   : > { %v607_v23 = vadd.f32 %v606_v3, %v2216_v9  ;;  %v608_v24 = vpop.f32.mrb[21].mxu0 }
 0x1be   : > { %v609_v25 = vadd.f32 %v608_v24, %v2220_v10  ;;  %v610_v26 = vpop.f32.mrb[22].mxu0  ;;  %943 = vmatprep.mubr.bf16.mxu1 %v662_v22 }
 0x1bf   : > { %v611_v27 = vadd.f32 %v610_v26, %v2216_v9  ;;  %v612_v28 = vpop.f32.mrb[23].mxu0  ;;  %944 = vmatmul.mubr.bf16.gmra.mrb[16].mxu1 %v661_v21  ;;  %v645_v30 = vmax.f32 %v607_v23, 0.0 }
 0x1c0   : > { %v613_v29 = vadd.f32 %v612_v28, %v2220_v10  ;;  %v646_v32 = vmax.f32 %v609_v25, 0.0 }
 0x1c1   : > { %v647_v31 = vmax.f32 %v611_v27, 0.0 }
 0x1c2   : > { %v648_v33 = vmax.f32 %v613_v29, 0.0 }
 0x1c3   : > { %v663_v34 = vpack.c.bf16 %v647_v31, %v645_v30 }
 0x1c4   : > { %v664_v35 = vpack.c.bf16 %v648_v33, %v646_v32  ;;  %v616_v36 = vpop.f32.mrb[24].mxu0 }
 0x1c5   : > { %v617_v37 = vadd.f32 %v616_v36, %v2216_v9  ;;  %v618_v38 = vpop.f32.mrb[25].mxu0 }
 0x1c6   : > { %v619_v39 = vadd.f32 %v618_v38, %v2220_v10  ;;  %v620_v40 = vpop.f32.mrb[26].mxu0  ;;  %953 = vmatprep.mubr.bf16.mxu1 %v664_v35 }
 0x1c7   : > { %v621_v41 = vadd.f32 %v620_v40, %v2216_v9  ;;  %v622_v42 = vpop.f32.mrb[27].mxu0  ;;  %954 = vmatmul.mubr.bf16.gmra.mrb[20].mxu1 %v663_v34  ;;  %v649_v44 = vmax.f32 %v617_v37, 0.0  ;;  %v1722_v9 = vld [vmem:[#allocation8 + $0x38] sm:$0xff]  }
 0x1c8   : > { %v623_v43 = vadd.f32 %v622_v42, %v2220_v10  ;;  %v650_v46 = vmax.f32 %v619_v39, 0.0  ;;  %1487 = vmatpush3.bf16.msra.mxu0 %v1722_v9  ;;  %1545 = vmatpush3.bf16.msra.mxu1 %v1722_v9  ;;  %v699_v10 = vld [vmem:[%s2399_s4] sm:$0x3] }
 0x1c9   : > { %v651_v45 = vmax.f32 %v621_v41, 0.0  ;;  %v2262_v53 = vrot.slane %v699_v10, %v392_v6  ;;  %v2266_v54 = vrot.slane %v699_v10, %v396_v8 }
 0x1ca   : > { %v652_v47 = vmax.f32 %v623_v43, 0.0 }
 0x1cb   : > { %v665_v48 = vpack.c.bf16 %v651_v45, %v649_v44 }
 0x1cc   : > { %v666_v49 = vpack.c.bf16 %v652_v47, %v650_v46 }
 0x1ce   : > { %963 = vmatprep.mubr.bf16.mxu1 %v666_v49 }
 0x1cf   : > { %964 = vmatmul.mubr.bf16.gmra.mrb[24].mxu1 %v665_v48 }
 0x272   : > { %v905_v55 = vpop.f32.mrb[0].mxu1 }
 0x273   : > { %v906_v56 = vadd.f32 %v905_v55, %v2262_v53  ;;  %v907_v57 = vpop.f32.mrb[1].mxu1 }
 0x274   : > { %v908_v58 = vadd.f32 %v907_v57, %v2266_v54  ;;  %v909_v59 = vpop.f32.mrb[2].mxu1 }
 0x275   : > { %v910_v60 = vadd.f32 %v909_v59, %v2262_v53  ;;  %v911_v61 = vpop.f32.mrb[3].mxu1  ;;  %v974_v63 = vmax.f32 %v906_v56, 0.0 }
 0x276   : > { %v912_v62 = vadd.f32 %v911_v61, %v2266_v54  ;;  %v975_v6 = vmax.f32 %v908_v58, 0.0 }
 0x277   : > { %v976_v4 = vmax.f32 %v910_v60, 0.0 }
 0x278   : > { %v977_v7 = vmax.f32 %v912_v62, 0.0 }
 0x279   : > { %v1002_v0 = vpack.c.bf16 %v976_v4, %v974_v63 }
 0x27a   : > { %v1003_v5 = vpack.c.bf16 %v977_v7, %v975_v6  ;;  %v915_v8 = vpop.f32.mrb[4].mxu1 }
 0x27b   : > { %v916_v11 = vadd.f32 %v915_v8, %v2262_v53  ;;  %v917_v12 = vpop.f32.mrb[5].mxu1 }
 0x27c   : > { %v918_v13 = vadd.f32 %v917_v12, %v2266_v54  ;;  %v919_v14 = vpop.f32.mrb[6].mxu1  ;;  %1183 = vmatprep.mubr.bf16.mxu0 %v1003_v5 }
 0x27d   : > { %v920_v15 = vadd.f32 %v919_v14, %v2262_v53  ;;  %v921_v1 = vpop.f32.mrb[7].mxu1  ;;  %1184 = vmatmul.mubr.bf16.vlgmr.msra.gmra.mrb[28].mxu0 %v1002_v0  ;;  %v978_v2 = vmax.f32 %v916_v11, 0.0 }
 0x27e   : > { %v922_v16 = vadd.f32 %v921_v1, %v2266_v54  ;;  %v979_v18 = vmax.f32 %v918_v13, 0.0 }
 0x27f   : > { %v980_v17 = vmax.f32 %v920_v15, 0.0 }
 0x280   : > { %v981_v19 = vmax.f32 %v922_v16, 0.0 }
 0x281   : > { %v1004_v20 = vpack.c.bf16 %v980_v17, %v978_v2 }
 0x282   : > { %v1005_v21 = vpack.c.bf16 %v981_v19, %v979_v18  ;;  %v925_v22 = vpop.f32.mrb[8].mxu1 }
 0x283   : > { %v926_v3 = vadd.f32 %v925_v22, %v2262_v53  ;;  %v927_v23 = vpop.f32.mrb[9].mxu1 }
 0x284   : > { %v928_v24 = vadd.f32 %v927_v23, %v2266_v54  ;;  %v929_v25 = vpop.f32.mrb[10].mxu1  ;;  %1191 = vmatprep.mubr.bf16.mxu0 %v1005_v21 }
 0x285   : > { %v930_v26 = vadd.f32 %v929_v25, %v2262_v53  ;;  %v931_v27 = vpop.f32.mrb[11].mxu1  ;;  %1192 = vmatmul.mubr.bf16.gmra.mrb[32].mxu0 %v1004_v20  ;;  %v982_v29 = vmax.f32 %v926_v3, 0.0 }
 0x286   : > { %v932_v28 = vadd.f32 %v931_v27, %v2266_v54  ;;  %v983_v31 = vmax.f32 %v928_v24, 0.0 }
 0x287   : > { %v984_v30 = vmax.f32 %v930_v26, 0.0 }
 0x288   : > { %v985_v32 = vmax.f32 %v932_v28, 0.0 }
 0x289   : > { %v1006_v33 = vpack.c.bf16 %v984_v30, %v982_v29  ;;  %v2300_v30 = vld [vmem:[%s2401_s6] ss:$0 sm:$0xff] }
 0x28a   : > { %v1007_v34 = vpack.c.bf16 %v985_v32, %v983_v31  ;;  %v935_v35 = vpop.f32.mrb[12].mxu1 }
 0x28b   : > { %v936_v36 = vadd.f32 %v935_v35, %v2262_v53  ;;  %v937_v37 = vpop.f32.mrb[13].mxu1 }
 0x28c   : > { %v938_v38 = vadd.f32 %v937_v37, %v2266_v54  ;;  %v939_v39 = vpop.f32.mrb[14].mxu1  ;;  %1199 = vmatprep.mubr.bf16.mxu0 %v1007_v34 }
 0x28d   : > { %v940_v40 = vadd.f32 %v939_v39, %v2262_v53  ;;  %v941_v41 = vpop.f32.mrb[15].mxu1  ;;  %1200 = vmatmul.mubr.bf16.gmra.mrb[36].mxu0 %v1006_v33  ;;  %v986_v43 = vmax.f32 %v936_v36, 0.0 }
 0x28e   : > { %v942_v42 = vadd.f32 %v941_v41, %v2266_v54  ;;  %v987_v45 = vmax.f32 %v938_v38, 0.0 }
 0x28f   : > { %v988_v44 = vmax.f32 %v940_v40, 0.0 }
 0x290   : > { %v989_v46 = vmax.f32 %v942_v42, 0.0 }
 0x291   : > { %v1008_v47 = vpack.c.bf16 %v988_v44, %v986_v43 }
 0x292   : > { %v1009_v48 = vpack.c.bf16 %v989_v46, %v987_v45  ;;  %v945_v49 = vpop.f32.mrb[16].mxu1 }
 0x293   : > { %v946_v50 = vadd.f32 %v945_v49, %v2262_v53  ;;  %v947_v51 = vpop.f32.mrb[17].mxu1 }
 0x294   : > { %v948_v52 = vadd.f32 %v947_v51, %v2266_v54  ;;  %v949_v9 = vpop.f32.mrb[18].mxu1  ;;  %1207 = vmatprep.mubr.bf16.mxu0 %v1009_v48 }
 0x295   : > { %v950_v10 = vadd.f32 %v949_v9, %v2262_v53  ;;  %v951_v55 = vpop.f32.mrb[19].mxu1  ;;  %1208 = vmatmul.mubr.bf16.gmra.mrb[40].mxu0 %v1008_v47  ;;  %v990_v57 = vmax.f32 %v946_v50, 0.0 }
 0x296   : > { %v952_v56 = vadd.f32 %v951_v55, %v2266_v54  ;;  %v991_v59 = vmax.f32 %v948_v52, 0.0 }
 0x297   : > { %v992_v58 = vmax.f32 %v950_v10, 0.0 }
 0x298   : > { %v993_v60 = vmax.f32 %v952_v56, 0.0 }
 0x299   : > { %v1010_v61 = vpack.c.bf16 %v992_v58, %v990_v57 }
 0x29a   : > { %v1011_v62 = vpack.c.bf16 %v993_v60, %v991_v59  ;;  %v955_v63 = vpop.f32.mrb[20].mxu1 }
 0x29b   : > { %v956_v4 = vadd.f32 %v955_v63, %v2262_v53  ;;  %v957_v6 = vpop.f32.mrb[21].mxu1 }
 0x29c   : > { %v958_v7 = vadd.f32 %v957_v6, %v2266_v54  ;;  %v959_v0 = vpop.f32.mrb[22].mxu1  ;;  %1215 = vmatprep.mubr.bf16.mxu0 %v1011_v62 }
 0x29d   : > { %v960_v5 = vadd.f32 %v959_v0, %v2262_v53  ;;  %v961_v8 = vpop.f32.mrb[23].mxu1  ;;  %1216 = vmatmul.mubr.bf16.gmra.mrb[44].mxu0 %v1010_v61  ;;  %v994_v12 = vmax.f32 %v956_v4, 0.0 }
 0x29e   : > { %v962_v11 = vadd.f32 %v961_v8, %v2266_v54  ;;  %v995_v14 = vmax.f32 %v958_v7, 0.0 }
 0x29f   : > { %v996_v13 = vmax.f32 %v960_v5, 0.0 }
 0x2a0   : > { %v997_v15 = vmax.f32 %v962_v11, 0.0 }
 0x2a1   : > { %v1012_v1 = vpack.c.bf16 %v996_v13, %v994_v12 }
 0x2a2   : > { %v1013_v16 = vpack.c.bf16 %v997_v15, %v995_v14  ;;  %v965_v2 = vpop.f32.mrb[24].mxu1 }
 0x2a3   : > { %v966_v17 = vadd.f32 %v965_v2, %v2262_v53  ;;  %v967_v18 = vpop.f32.mrb[25].mxu1 }
 0x2a4   : > { %v968_v19 = vadd.f32 %v967_v18, %v2266_v54  ;;  %v969_v20 = vpop.f32.mrb[26].mxu1  ;;  %1223 = vmatprep.mubr.bf16.mxu0 %v1013_v16 }
 0x2a5   : > { %v970_v21 = vadd.f32 %v969_v20, %v2262_v53  ;;  %v971_v22 = vpop.f32.mrb[27].mxu1  ;;  %1224 = vmatmul.mubr.bf16.gmra.mrb[48].mxu0 %v1012_v1  ;;  %v998_v23 = vmax.f32 %v966_v17, 0.0 }
 0x2a6   : > { %v972_v3 = vadd.f32 %v971_v22, %v2266_v54  ;;  %v999_v25 = vmax.f32 %v968_v19, 0.0 }
 0x2a7   : > { %v1000_v24 = vmax.f32 %v970_v21, 0.0 }
 0x2a8   : > { %v1001_v26 = vmax.f32 %v972_v3, 0.0 }
 0x2a9   : > { %v1014_v27 = vpack.c.bf16 %v1000_v24, %v998_v23 }
 0x2aa   : > { %v1015_v28 = vpack.c.bf16 %v1001_v26, %v999_v25 }
 0x2ac   : > { %1231 = vmatprep.mubr.bf16.mxu1 %v1015_v28 }
 0x2ad   : > { %1232 = vmatmul.mubr.bf16.vlgmr.msra.gmra.mrb[28].mxu1 %v1014_v27 }
 0x350   : > { %v1488_v29 = vpop.f32.mrb[28].mxu0 }
 0x351   : > { %v1489_v53 = vpop.f32.mrb[29].mxu0 }
 0x352   : > { %v1490_v31 = vadd.f32 %v1489_v53, %v1488_v29  ;;  %v1491_v32 = vpop.f32.mrb[30].mxu0 }
 0x353   : > { %v1492_v33 = vpop.f32.mrb[31].mxu0 }
 0x354   : > { %v1186_v54 = vadd.f32 %v1490_v31, %v2300_v30  ;;  %v1493_v34 = vadd.f32 %v1492_v33, %v1491_v32 }
 0x356   : > { %1240 = vst [vmem:[%s2303_s9] sm:$0xff] %v1186_v54  ;;  %v1189_v35 = vadd.f32 %v1493_v34, %v2300_v30 }
 0x358   : > { %1241 = vst [vmem:[%s2303_s9 + $0x8] sm:$0xff] %v1189_v35  ;;  %v1494_v36 = vpop.f32.mrb[32].mxu0 }
 0x359   : > { %v1495_v37 = vpop.f32.mrb[33].mxu0 }
 0x35a   : > { %v1496_v38 = vadd.f32 %v1495_v37, %v1494_v36  ;;  %v1497_v39 = vpop.f32.mrb[34].mxu0 }
 0x35b   : > { %v1498_v40 = vpop.f32.mrb[35].mxu0 }
 0x35c   : > { %v1194_v41 = vadd.f32 %v1496_v38, %v2300_v30  ;;  %v1499_v42 = vadd.f32 %v1498_v40, %v1497_v39 }
 0x35e   : > { %1242 = vst [vmem:[%s2303_s9 + $0x10] sm:$0xff] %v1194_v41  ;;  %v1197_v43 = vadd.f32 %v1499_v42, %v2300_v30 }
 0x360   : > { %1243 = vst [vmem:[%s2303_s9 + $0x18] sm:$0xff] %v1197_v43  ;;  %v1500_v44 = vpop.f32.mrb[36].mxu0 }
 0x361   : > { %v1501_v45 = vpop.f32.mrb[37].mxu0 }
 0x362   : > { %v1502_v46 = vadd.f32 %v1501_v45, %v1500_v44  ;;  %v1503_v47 = vpop.f32.mrb[38].mxu0 }
 0x363   : > { %v1504_v48 = vpop.f32.mrb[39].mxu0 }
 0x364   : > { %v1202_v49 = vadd.f32 %v1502_v46, %v2300_v30  ;;  %v1505_v50 = vadd.f32 %v1504_v48, %v1503_v47 }
 0x366   : > { %1244 = vst [vmem:[%s2303_s9 + $0x20] sm:$0xff] %v1202_v49  ;;  %v1205_v51 = vadd.f32 %v1505_v50, %v2300_v30 }
 0x368   : > { %1245 = vst [vmem:[%s2303_s9 + $0x28] sm:$0xff] %v1205_v51  ;;  %v1506_v52 = vpop.f32.mrb[40].mxu0 }
 0x369   : > { %v1507_v9 = vpop.f32.mrb[41].mxu0 }
 0x36a   : > { %v1508_v10 = vadd.f32 %v1507_v9, %v1506_v52  ;;  %v1509_v55 = vpop.f32.mrb[42].mxu0 }
 0x36b   : > { %v1510_v56 = vpop.f32.mrb[43].mxu0 }
 0x36c   : > { %v1210_v57 = vadd.f32 %v1508_v10, %v2300_v30  ;;  %v1511_v58 = vadd.f32 %v1510_v56, %v1509_v55 }
 0x36e   : > { %1246 = vst [vmem:[%s2303_s9 + $0x30] sm:$0xff] %v1210_v57  ;;  %v1213_v59 = vadd.f32 %v1511_v58, %v2300_v30 }
 0x370   : > { %1247 = vst [vmem:[%s2303_s9 + $0x38] sm:$0xff] %v1213_v59  ;;  %v1512_v60 = vpop.f32.mrb[44].mxu0 }
 0x371   : > { %v1513_v61 = vpop.f32.mrb[45].mxu0 }
 0x372   : > { %v1514_v62 = vadd.f32 %v1513_v61, %v1512_v60  ;;  %v1515_v63 = vpop.f32.mrb[46].mxu0 }
 0x373   : > { %v1516_v4 = vpop.f32.mrb[47].mxu0 }
 0x374   : > { %v1218_v6 = vadd.f32 %v1514_v62, %v2300_v30  ;;  %v1517_v7 = vadd.f32 %v1516_v4, %v1515_v63 }
 0x376   : > { %1248 = vst [vmem:[%s2303_s9 + $0x40] sm:$0xff] %v1218_v6  ;;  %v1221_v0 = vadd.f32 %v1517_v7, %v2300_v30 }
 0x378   : > { %1249 = vst [vmem:[%s2303_s9 + $0x48] sm:$0xff] %v1221_v0  ;;  %v1518_v5 = vpop.f32.mrb[48].mxu0 }
 0x379   : > { %v1519_v8 = vpop.f32.mrb[49].mxu0 }
 0x37a   : > { %v1520_v11 = vadd.f32 %v1519_v8, %v1518_v5  ;;  %v1521_v12 = vpop.f32.mrb[50].mxu0 }
 0x37b   : > { %v1522_v13 = vpop.f32.mrb[51].mxu0 }
 0x37c   : > { %v1226_v14 = vadd.f32 %v1520_v11, %v2300_v30  ;;  %v1523_v15 = vadd.f32 %v1522_v13, %v1521_v12 }
 0x37e   : > { %1250 = vst [vmem:[%s2303_s9 + $0x50] sm:$0xff] %v1226_v14  ;;  %v1229_v1 = vadd.f32 %v1523_v15, %v2300_v30 }
 0x380   : > { %1251 = vst [vmem:[%s2303_s9 + $0x58] sm:$0xff] %v1229_v1  ;;  %v1524_v16 = vpop.f32.mrb[28].mxu1 }
 0x381   : > { %v1525_v2 = vpop.f32.mrb[29].mxu1 }
 0x382   : > { %v1526_v17 = vadd.f32 %v1525_v2, %v1524_v16  ;;  %v1527_v18 = vpop.f32.mrb[30].mxu1  ;;  %1261 = sbr.rel (!%p2430_p1) target bundleno = 933 (0x3a5), region = 68 }
 0x383   : > { %v1528_v19 = vpop.f32.mrb[31].mxu1 }
 0x384   : > { %v1234_v20 = vadd.f32 %v1526_v17, %v2300_v30  ;;  %v1529_v21 = vadd.f32 %v1528_v19, %v1527_v18 }
 0x386   : > { %1252 = vst [vmem:[%s2303_s9 + $0x60] sm:$0xff] %v1234_v20  ;;  %v1237_v22 = vadd.f32 %v1529_v21, %v2300_v30 }
 0x388   : > { %1253 = vst [vmem:[%s2303_s9 + $0x68] sm:$0xff] %v1237_v22 }
 0x389   : > { %s2442_s8 = smov (!%p1264_p3, %s1263_s8), 14 }
 0x38a   : > { %s2336_s14 = sshll.u32 %s2442_s8, 7 }
 0x38b   : > { %s1268_s16 = ssub.s32 1792, %s2336_s14 }
 0x38c   : > { %1269 = vsyncadd %s1255_s30, %s1268_s16  ;;  %p1464_p6 = scmp.ne.s32.totalorder %s2336_s14, 0  ;;  %s1471_s13 = smul.u32 1792, %s1986_s28 }
 0x38d   : > { %s1274_s11 = sshll.u32 %s2303_s9, 4  ;;  %s1922_s12 = smov [#allocation10]   ;;  %s2349_s11 = int_to_ptr.vmem [resolvable:$true] %s1274_s11 }
 0x38e   : > { %s2347_s29 = scalar_lea.hbm %s2402_s7, %s1471_s13  ;;  %s1835_s24 = scalar_lea.vmem %s2349_s11, %s2336_s14 }
 0x38f   : > { %p1836_p5 = scmp.ne.s32.totalorder %s2349_s11, %s1835_s24  ;;  %s1839_s15 = sshll.u32 %s1922_s12, 4  ;;  %s1840_s15 = int_to_ptr.vmem [resolvable:$false] %s1839_s15 }
 0x390   : > { %s1841_s28 = scalar_lea.vmem %s1840_s15, 3584  ;;  %p1842_p0 = scmp.lt.s32.totalorder %s2349_s11, %s1840_s15 }
 0x391   : > { %p1837_p11 = pnand %p1836_p5, %p1464_p6  ;;  %p1843_p12 = scmp.lt.s32.totalorder %s1841_s28, %s1835_s24 }
 0x393   : > { %p1838_p13 = pneg %p1837_p11  ;;  %p1844_p7 = por %p1843_p12, %p1842_p0 }
 0x395   : > { %p1845_p2 = pnand %p1844_p7, %p1838_p13 }
 0x397   : > { %1848 = shalt.err (!%p1845_p2)
}
 0x398   : > { %s1849_s18 = scalar_lea.hbm %s2347_s29, %s2336_s14  ;;  %s1853_s20 = scalar_lea.hbm %s2402_s7, 3200 }
 0x399   : > { %p1850_p8 = scmp.ne.s32.totalorder %s2347_s29, %s1849_s18  ;;  %p1854_p1 = scmp.lt.u32.totalorder %s2347_s29, %s2402_s7 }
 0x39a   : > { %p1855_p3 = scmp.lt.u32.totalorder %s1853_s20, %s1849_s18  ;;  %p1857_p11 = scmp.lt.u32.totalorder %s1849_s18, %s2347_s29 }
 0x39b   : > { %p1851_p9 = pnand %p1850_p8, %p1464_p6 }
 0x39c   : > { %p1856_p5 = por %p1855_p3, %p1854_p1 }
 0x39d   : > { %p1852_p10 = pneg %p1851_p9 }
 0x39e   : > { %p1858_p13 = por %p1857_p11, %p1856_p5 }
 0x3a0   : > { %p1859_p0 = pnand %p1858_p13, %p1852_p10 }
 0x3a2   : > { %1862 = shalt.err (!%p1859_p0)
}
 0x3a3   : > { %s1923_s10 = smov 128   ;;  %s1924_s8 = smov 8  }
 0x3a4   : > { %1280 = dma.vmem_to_hbm [thread:$0]  (%p1464_p6), %s2349_s11, %s2336_s14, %s2347_s29, %s1255_s30, %s1923_s10, %s1923_s10, %s1924_s8  }
 0x3a5 PF: > { %s2431_s16 = sld [smem:[#allocation15_spill]]  ;;  %s2432_s13 = sld [smem:[#allocation18_spill]] }
 0x3ab   : > { %s1289_s21 = sand.u32 1, %s2431_s16   ;;  %p2433_p12 = scmp.ne.s32.totalorder %s2432_s13, 0 }
 0x3ac   : > { %s1290_s22 = scalar_lea.sflag [#allocation4], %s1289_s21 }
 0x3ad   : > { %p1574_p7 = pnand %p1381_p4, %p2433_p12 }
 0x3af   : > { %1892 = dma.done.wait (!%p1574_p7), %s1290_s22, 1792  }
 0x3b0   : > { %1894 = vsyncadd (!%p1574_p7), %s1290_s22, 4294965504  ;;  %s2434_s27 = sld [smem:[#allocation16_spill]]  ;;  %s2435_s12 = sld [smem:[#allocation17_spill]] }
 0x3b1   : > { %s2436_s24 = smov %s1901_s25  ;;  %s2437_s25 = smov %s1905_s26 }
 0x3b6   : > { %p22_p2 = scmp.ge.s32.totalorder %s2434_s27, 4   ;;  %s2438_s26 = smov %s2435_s12 }
 0x3b8   :  { %24 = sbr.rel (!%p22_p2) target bundleno = 9 (0x9), region = 105 }
 0x3bf   :  { %1295 = vsyncpa [#allocation3], 1 }
 0x3c0   :  { %1297 = vsyncpa [#allocation3 + $0x1], 1 }
 0x3c1   :  { %1298 = vsyncpa [#allocation6], 1 }
 0x3c2   :  { %1299 = vsyncpa [#allocation9], 1 }
 0x3c3   :  { %1300 = vsyncpa [#allocation4], 1 }
 0x3c4   :  { %1302 = vsyncpa [#allocation4 + $0x1], 1 }

// kernel: tpu_custom_call.1
= control target key start
LH: loop header
LB: loop body
LE: loop exit
PB: predicated region body
PF: predicated region fallthrough
CT: control target
= control target key end

     0   :  { %s2395_s0 = inlined_call_operand.hbm [shape: bf16[200,128], index: 0, kind: input, shape index: {}]   ;;  %s2396_s1 = inlined_call_operand.hbm [shape: bf16[128,256], index: 1, kind: input, shape index: {}]   ;;  %s2397_s2 = inlined_call_operand.vmem [shape: f32[1,256], index: 2, kind: input, shape index: {}]   ;;  %s2398_s3 = inlined_call_operand.hbm [shape: bf16[256,256], index: 3, kind: input, shape index: {}]   ;;  %s2399_s4 = inlined_call_operand.vmem [shape: f32[1,256], index: 4, kind: input, shape index: {}]   ;;  %s2400_s5 = inlined_call_operand.hbm [shape: bf16[256,128], index: 5, kind: input, shape index: {}]   ;;  %s2401_s6 = inlined_call_operand.vmem [shape: f32[1,128], index: 6, kind: input, shape index: {}]   ;;  %s2402_s7 = inlined_call_operand.hbm [shape: f32[200,128], index: 7, kind: output, shape index: {}]  }
   0x1   :  { %2410 = sst [smem:[#allocation19_spill]] %s2396_s1 }
   0x2   :  { %12 = vsyncpa [#allocation3], 0 }
   0x3   :  { %14 = vsyncpa [#allocation3 + $0x1], 0 }
   0x4   :  { %15 = vsyncpa [#allocation6], 0 }
   0x5   :  { %16 = vsyncpa [#allocation9], 0 }
   0x6   :  { %17 = vsyncpa [#allocation4], 0 }
   0x7   :  { %19 = vsyncpa [#allocation4 + $0x1], 0  ;;  %s1965_s24 = smov 0   ;;  %s1967_s25 = smov 0  }
   0x8   :  { %s1969_s26 = smov 0   ;;  %s1971_s27 = smov 0  }
   0x9 LB: > { %2411 = sst [smem:[#allocation15_spill]] %s1897_s24  ;;  %s1986_s28 = sadd.s32 4294967295, %s1909_s27   ;;  %s1909_s27 = sphi %s1971_s27, %s2434_s27   ;;  %s1905_s26 = sphi %s1969_s26, %s2438_s26   ;;  %s1901_s25 = sphi %s1967_s25, %s2437_s25   ;;  %s1897_s24 = sphi %s1965_s24, %s2436_s24  }
   0xa   : > { %s1376_s29 = sadd.s32 4294967294, %s1909_s27   ;;  %s1990_s30 = sadd.s32 1, %s1909_s27  }
   0xb   : > { %2412 = sst [smem:[#allocation16_spill]] %s1990_s30  ;;  %s32_s8 = sadd.s32 1, %s1905_s26 }
   0xc   : > { %s29_s9 = ssub.s32 %s1909_s27, %s1990_s30  ;;  %p39_p0 = scmp.ne.s32.totalorder %s1905_s26, %s1901_s25 }
   0xd   : > { %p30_p1 = scmp.eq.s32.totalorder %s29_s9, 0  ;;  %p40_p2 = scmp.eq.s32.totalorder %s1909_s27, 0 }
   0xe   : > { %p45_p3 = scmp.ne.s32.totalorder %s1901_s25, %s1897_s24  ;;  %p2403_p4 = scmp.eq.s32.totalorder %s1986_s28, 0 }
   0xf   : > { %s2002_s10 = scalar_select %p30_p1, %s1905_s26, %s32_s8  }
  0x10   : > { %p2004_p5 = por %p40_p2, %p39_p0  ;;  %p2010_p6 = por %p2403_p4, %p45_p3 }
  0x11   : > { %2413 = sst [smem:[#allocation17_spill]] %s2002_s10  ;;  %p195_p7 = scmp.eq.s32.totalorder %s1986_s28, 1 }
  0x12   : > { %s2414_s11 = scalar_select %p2004_p5, 1, 0 }
  0x13   : > { %s2415_s12 = scalar_select %p2010_p6, 1, 0 }
  0x14   : > { %p201_p8 = scmp.eq.s32.totalorder %s1376_s29, 1  ;;  %p1377_p9 = scmp.ge.s32.totalorder %s1909_s27, 1 }
  0x15   : > { %p208_p10 = scmp.lt.s32.totalorder %s1909_s27, 3  ;;  %p2017_p11 = por %p195_p7, %p39_p0 }
  0x16   : > { %p2021_p12 = por %p201_p8, %p45_p3  ;;  %s1911_s16 = smov [#allocation5]  }
  0x17   : > { %s2416_s13 = scalar_select %p2017_p11, 1, 0 }
  0x18   : > { %s2417_s14 = scalar_select %p2021_p12, 1, 0 }
  0x19   : > { %p2025_p13 = pnand %p1377_p9, %p208_p10  ;;  %s220_s17 = sshll.u32 %s1911_s16, 4  ;;  %s221_s17 = int_to_ptr.vmem [resolvable:$true] %s220_s17 }
  0x1a   : > { %2418 = sst [smem:[#allocation18_spill]] %s2417_s14  ;;  %s1912_s19 = smov [#allocation7]  }
  0x1b   : > { %s2419_s15 = scalar_select %p2025_p13, 1, 0 }
  0x1c   : > { %p1563_p1 = pneg %p2025_p13  ;;  %s236_s20 = sshll.u32 %s1912_s19, 4  ;;  %s2037_s20 = int_to_ptr.vmem [resolvable:$true] %s236_s20 }
  0x1d   : > { %s2421_s1 = sld [smem:[#allocation19_spill]] }
  0x1e   : > { %p2033_p2 = pnand %p1563_p1, %p2403_p4 }
  0x20   : > { %p2047_p3 = pneg %p2033_p2 }
  0x23   : > { %s1723_s23 = scalar_lea.hbm %s2421_s1, 2048 }
  0x24   : > { %p1724_p0 = scmp.ne.s32.totalorder %s2421_s1, %s1723_s23  ;;  %p1730_p9 = scmp.lt.u32.totalorder %s1723_s23, %s2421_s1 }
  0x26   : > { %p1726_p7 = pnand %p2047_p3, %p1724_p0 }
  0x28   : > { %p1727_p8 = pneg %p1726_p7 }
  0x2a   : > { %p1732_p10 = pnand %p1730_p9, %p1727_p8 }
  0x2c   : > { %1735 = shalt.err (!%p1732_p10)
}
  0x2d   : > { %s1736_s21 = scalar_lea.vmem %s221_s17, 2048  ;;  %p1744_p11 = scmp.lt.s32.totalorder %s221_s17, %s221_s17 }
  0x2e   : > { %p1737_p1 = scmp.ne.s32.totalorder %s221_s17, %s1736_s21  ;;  %p1745_p6 = scmp.lt.s32.totalorder %s1736_s21, %s1736_s21 }
  0x30   : > { %p1739_p4 = pnand %p1737_p1, %p2047_p3  ;;  %p1746_p13 = por %p1745_p6, %p1744_p11 }
  0x32   : > { %p1740_p12 = pneg %p1739_p4 }
  0x34   : > { %p1747_p5 = pnand %p1746_p13, %p1740_p12 }
  0x36   : > { %1750 = shalt.err (!%p1747_p5)
}
  0x37   : > { %s1913_s22 = smov 128   ;;  %s1914_s29 = smov 8  }
  0x38   : > { %1566 = dma.hbm_to_vmem [thread:$0]  (!%p2033_p2), %s2421_s1, 2048, %s221_s17, [#allocation6], %s1913_s22, %s1913_s22, %s1914_s29  }
  0x39   : > { %s1751_s10 = scalar_lea.hbm %s2398_s3, 4096 }
  0x3a   : > { %p1752_p4 = scmp.ne.s32.totalorder %s2398_s3, %s1751_s10  ;;  %p1758_p11 = scmp.lt.u32.totalorder %s1751_s10, %s2398_s3 }
  0x3c   : > { %p1754_p6 = pnand %p1752_p4, %p2047_p3 }
  0x3e   : > { %p1755_p5 = pneg %p1754_p6 }
  0x40   : > { %p1760_p12 = pnand %p1758_p11, %p1755_p5 }
  0x42   : > { %1763 = shalt.err (!%p1760_p12)
}
  0x43   : > { %s1764_s17 = scalar_lea.vmem %s2037_s20, 4096  ;;  %p1772_p8 = scmp.lt.s32.totalorder %s2037_s20, %s2037_s20 }
  0x44   : > { %p1765_p13 = scmp.ne.s32.totalorder %s2037_s20, %s1764_s17  ;;  %p1773_p9 = scmp.lt.s32.totalorder %s1764_s17, %s1764_s17 }
  0x46   : > { %p1767_p0 = pnand %p1765_p13, %p2047_p3  ;;  %p1774_p10 = por %p1773_p9, %p1772_p8 }
  0x48   : > { %p1768_p7 = pneg %p1767_p0 }
  0x4a   : > { %p1775_p1 = pnand %p1774_p10, %p1768_p7 }
  0x4c   : > { %1778 = shalt.err (!%p1775_p1)
}
  0x4d   : > { %1569 = dma.hbm_to_vmem [thread:$0]  (!%p2033_p2), %s2398_s3, 4096, %s2037_s20, [#allocation6], %s1913_s22, %s1913_s22, %s1914_s29  }
  0x4e   : > { %s1915_s10 = smov [#allocation8]   ;;  %s1779_s16 = scalar_lea.hbm %s2400_s5, 2048 }
  0x4f   : > { %s252_s14 = sshll.u32 %s1915_s10, 4  ;;  %p1780_p4 = scmp.ne.s32.totalorder %s2400_s5, %s1779_s16  ;;  %s253_s14 = int_to_ptr.vmem [resolvable:$true] %s252_s14 }
  0x50   : > { %p1786_p11 = scmp.lt.u32.totalorder %s1779_s16, %s2400_s5 }
  0x51   : > { %p1782_p6 = pnand %p1780_p4, %p2047_p3 }
  0x53   : > { %p1783_p5 = pneg %p1782_p6 }
  0x55   : > { %p1788_p12 = pnand %p1786_p11, %p1783_p5 }
  0x57   : > { %1791 = shalt.err (!%p1788_p12)
}
  0x58   : > { %s1792_s20 = scalar_lea.vmem %s253_s14, 2048  ;;  %p1800_p8 = scmp.lt.s32.totalorder %s253_s14, %s253_s14 }
  0x59   : > { %p1793_p13 = scmp.ne.s32.totalorder %s253_s14, %s1792_s20  ;;  %p1801_p9 = scmp.lt.s32.totalorder %s1792_s20, %s1792_s20 }
  0x5b   : > { %p1795_p0 = pnand %p1793_p13, %p2047_p3  ;;  %p1802_p10 = por %p1801_p9, %p1800_p8 }
  0x5d   : > { %p1796_p7 = pneg %p1795_p0 }
  0x5f   : > { %p1803_p1 = pnand %p1802_p10, %p1796_p7 }
  0x61   : > { %1806 = shalt.err (!%p1803_p1)
}
  0x62   : > { %s1916_s22 = smov 64   ;;  %s1917_s29 = smov 4  }
  0x63   : > { %1572 = dma.hbm_to_vmem [thread:$0]  (!%p2033_p2), %s2400_s5, 2048, %s253_s14, [#allocation9], %s1916_s22, %s1916_s22, %s1917_s29  }
  0x64   : > { %p1381_p4 = scmp.ge.s32.totalorder %s1909_s27, 2 }
  0x65   : > { %p2423_p3 = scmp.ne.s32.totalorder (!%p1381_p4), %s2414_s11, 0 }
  0x66   : > { %265 = sbr.rel (%p1381_p4) target bundleno = 144 (0x90), region = 40 }
  0x6d   : > { %268 = sbr.rel (!%p2423_p3) target bundleno = 144 (0x90), region = 44  ;;  %s269_s9 = sand.u32 (%p2423_p3), 1, %s1905_s26  }
  0x6e   : > { %s274_s30 = smul.u32 (%p2423_p3), 14, %s1909_s27  ;;  %s2114_s23 = scalar_lea.sflag (%p2423_p3), [#allocation3], %s269_s9 }
  0x6f   : > { %s1546_s10 = smul.u32 (%p2423_p3), 56, %s269_s9 }
  0x70   : > { %s275_s8 = ssub.s32 (%p2423_p3), 25, %s274_s30 }
  0x71   : > { %p276_p6 = scmp.lt.s32.totalorder (%p2423_p3), %s275_s8, 14  ;;  %s273_s16 = scalar_lea.vmem (%p2423_p3), [#allocation2], %s1546_s10 }
  0x74   : > { %s2440_s8 = smov (!%p276_p6, %s275_s8), 14 }
  0x75   : > { %s2111_s18 = sshll.u32 %s2440_s8, 6 }
  0x76   : > { %s280_s14 = ssub.s32 896, %s2111_s18 }
  0x77   : > { %281 = vsyncadd %s2114_s23, %s280_s14  ;;  %p1383_p2 = scmp.ne.s32.totalorder %s2111_s18, 0  ;;  %s1470_s11 = smul.u32 896, %s1909_s27 }
  0x78   : > { %s286_s19 = sshll.u32 %s273_s16, 4  ;;  %s1811_s1 = scalar_lea.hbm %s2395_s0, 1600  ;;  %s2124_s19 = int_to_ptr.vmem [resolvable:$true] %s286_s19 }
  0x79   : > { %s2122_s20 = scalar_lea.hbm %s2395_s0, %s1470_s11 }
  0x7a   : > { %s1807_s22 = scalar_lea.hbm %s2122_s20, %s2111_s18  ;;  %p1812_p13 = scmp.lt.u32.totalorder %s2122_s20, %s2395_s0 }
  0x7b   : > { %p1808_p5 = scmp.ne.s32.totalorder %s2122_s20, %s1807_s22  ;;  %p1813_p0 = scmp.lt.u32.totalorder %s1811_s1, %s1807_s22 }
  0x7c   : > { %p1815_p8 = scmp.lt.u32.totalorder %s1807_s22, %s2122_s20 }
  0x7d   : > { %p1809_p11 = pnand %p1808_p5, %p1383_p2  ;;  %p1814_p7 = por %p1813_p0, %p1812_p13 }
  0x7f   : > { %p1810_p12 = pneg %p1809_p11  ;;  %p1816_p9 = por %p1815_p8, %p1814_p7 }
  0x81   : > { %p1817_p10 = pnand %p1816_p9, %p1810_p12 }
  0x83   : > { %1820 = shalt.err (!%p1817_p10)
}
  0x84   : > { %s1821_s10 = scalar_lea.vmem %s2124_s19, %s2111_s18  ;;  %s1918_s8 = smov [#allocation2]  }
  0x85   : > { %p1822_p1 = scmp.ne.s32.totalorder %s2124_s19, %s1821_s10  ;;  %s1825_s14 = sshll.u32 %s1918_s8, 4  ;;  %s1826_s14 = int_to_ptr.vmem [resolvable:$false] %s1825_s14 }
  0x86   : > { %s1827_s16 = scalar_lea.vmem %s1826_s14, 1792  ;;  %p1828_p5 = scmp.lt.s32.totalorder %s2124_s19, %s1826_s14 }
  0x87   : > { %p1823_p3 = pnand %p1822_p1, %p1383_p2  ;;  %p1829_p11 = scmp.lt.s32.totalorder %s1827_s16, %s1821_s10 }
  0x89   : > { %p1824_p6 = pneg %p1823_p3  ;;  %p1830_p13 = por %p1829_p11, %p1828_p5 }
  0x8b   : > { %p1831_p0 = pnand %p1830_p13, %p1824_p6 }
  0x8d   : > { %1834 = shalt.err (!%p1831_p0)
}
  0x8e   : > { %s1919_s11 = smov 64   ;;  %s1920_s21 = smov 4  }
  0x8f   : > { %292 = dma.hbm_to_vmem [thread:$0]  (%p1383_p2), %s2122_s20, %s2111_s18, %s2124_s19, %s2114_s23, %s1919_s11, %s1919_s11, %s1920_s21  }
  0x90 PF: > { %p2424_p12 = scmp.ne.s32.totalorder %s2419_s15, 0 }
  0x91   : > { %s2154_s17 = sand.u32 (!%p2424_p12), 1, %s1901_s25   ;;  %p2425_p7 = scmp.ne.s32.totalorder (!%p2424_p12), %s2415_s12, 0 }
  0x92   : > { %298 = sbr.rel (%p2424_p12) target bundleno = 933 (0x3a5), region = 48  ;;  %s301_s29 = scalar_lea.sflag (!%p2424_p12), [#allocation3], %s2154_s17 }
  0x93   : > { %s1547_s22 = smul.u32 (!%p2424_p12), 56, %s2154_s17 }
  0x95   : > { %s2158_s24 = scalar_lea.vmem (!%p2424_p12), [#allocation2], %s1547_s22 }
  0x99   : > { %1880 = dma.done.wait (%p2425_p7), %s301_s29, 896  }
  0x9a   : > { %1882 = vsyncadd (%p2425_p7), %s301_s29, 4294966400  ;;  %p2426_p2 = scmp.eq.s32.totalorder %s1986_s28, 0 }
  0x9c   : > { %1884 = dma.done.wait (%p2426_p2), [#allocation6], 6144   ;;  %p2427_p8 = pmov %p2426_p2 }
  0x9d   : > { %p2428_p9 = pmov %p2426_p2 }
  0x9e   : > { %1886 = vsyncadd (%p2427_p8), [#allocation6], 4294961152 }
  0x9f   : > { %1888 = dma.done.wait (%p2428_p9), [#allocation9], 2048   ;;  %p2429_p10 = pmov %p2426_p2 }
  0xa0   : > { %v1921_v0 = vmov 0   ;;  %v1628_v1 = vld [vmem:[#allocation5 + $0x4] ss:$8 sps:$4 sm:$0xff]   ;;  %v1630_v2 = vld [vmem:[#allocation5] ss:$8 sps:$4 sm:$0xff]   ;;  %v1653_v30 = vld [vmem:[%s2158_s24 + $0x8] sm:$0xff]  }
  0xa1   : > { %1890 = vsyncadd (%p2429_p10), [#allocation9], 4294965248  ;;  %554 = vmatprep.mubr.bf16.mxu0 %v1921_v0  ;;  %522 = vmatprep.subr.bf16.mxu0 %v1628_v1  ;;  %v1631_v3 = vld [vmem:[#allocation5 + $0x14] ss:$8 sps:$4 sm:$0xff]   ;;  %v1633_v4 = vld [vmem:[#allocation5 + $0x10] ss:$8 sps:$4 sm:$0xff]  }
  0xa2   : > { %523 = vmatpush1.bf16.msra.mxu0 %v1630_v2  ;;  %v1634_v5 = vld [vmem:[#allocation5 + $0x24] ss:$8 sps:$4 sm:$0xff]   ;;  %v1636_v6 = vld [vmem:[#allocation5 + $0x20] ss:$8 sps:$4 sm:$0xff]   ;;  %v1637_v7 = vld [vmem:[#allocation5 + $0x34] ss:$8 sps:$4 sm:$0xff]  }
  0xa3   : > { %524 = vmatprep.subr.bf16.mxu0 %v1631_v3  ;;  %v1639_v8 = vld [vmem:[#allocation5 + $0x30] ss:$8 sps:$4 sm:$0xff]   ;;  %v1640_v9 = vld [vmem:[#allocation5 + $0x44] ss:$8 sps:$4 sm:$0xff]   ;;  %v1642_v10 = vld [vmem:[#allocation5 + $0x40] ss:$8 sps:$4 sm:$0xff]  }
  0xa4   : > { %v1643_v11 = vld [vmem:[#allocation5 + $0x54] ss:$8 sps:$4 sm:$0xff]   ;;  %v1645_v12 = vld [vmem:[#allocation5 + $0x50] ss:$8 sps:$4 sm:$0xff]   ;;  %v1659_v13 = vld [vmem:[#allocation7 + $0x4] ss:$8 sps:$4 sm:$0xff]  }
  0xa5   : > { %v1661_v14 = vld [vmem:[#allocation7] ss:$8 sps:$4 sm:$0xff]   ;;  %v1662_v15 = vld [vmem:[#allocation7 + $0x14] ss:$8 sps:$4 sm:$0xff]   ;;  %v1646_v16 = vld [vmem:[#allocation5 + $0x64] ss:$8 sps:$4 sm:$0xff]   ;;  %871 = vmatprep.subr.bf16.mxu1 %v1659_v13 }
  0xa6   : > { %525 = vmatpush1.bf16.msra.mxu0 %v1633_v4  ;;  %872 = vmatpush1.bf16.msra.mxu1 %v1661_v14  ;;  %v1664_v17 = vld [vmem:[#allocation7 + $0x10] ss:$8 sps:$4 sm:$0xff]   ;;  %v1665_v18 = vld [vmem:[#allocation7 + $0x24] ss:$8 sps:$4 sm:$0xff]   ;;  %v1648_v19 = vld [vmem:[#allocation5 + $0x60] ss:$8 sps:$4 sm:$0xff]   ;;  %v390_v4 = vlaneseq }
  0xa7   : > { %526 = vmatprep.subr.bf16.mxu0 %v1634_v5  ;;  %873 = vmatprep.subr.bf16.mxu1 %v1662_v15  ;;  %v1649_v20 = vld [vmem:[#allocation5 + $0x74] ss:$8 sps:$4 sm:$0xff]   ;;  %v1667_v21 = vld [vmem:[#allocation7 + $0x20] ss:$8 sps:$4 sm:$0xff]   ;;  %v1651_v23 = vld [vmem:[#allocation5 + $0x70] ss:$8 sps:$4 sm:$0xff]  }
  0xa8   : > { %v1668_v22 = vld [vmem:[#allocation7 + $0x34] ss:$8 sps:$4 sm:$0xff]   ;;  %v1670_v24 = vld [vmem:[#allocation7 + $0x30] ss:$8 sps:$4 sm:$0xff]   ;;  %v1671_v26 = vld [vmem:[#allocation7 + $0x44] ss:$8 sps:$4 sm:$0xff]  }
  0xa9   : > { %v1652_v25 = vld [vmem:[%s2158_s24] sm:$0xff]   ;;  %v1654_v35 = vld [vmem:[%s2158_s24 + $0x10] sm:$0xff]   ;;  %v1655_v40 = vld [vmem:[%s2158_s24 + $0x18] sm:$0xff]   ;;  %v2207_v5 = vshrl.u32 %v390_v4, 7  ;;  %s1548_s19 = smul.u32 112, %s2154_s17  ;;  %s1255_s30 = scalar_lea.sflag [#allocation4], %s2154_s17 }
  0xaa   : > { %527 = vmatpush1.bf16.msra.mxu0 %v1636_v6  ;;  %874 = vmatpush1.bf16.msra.mxu1 %v1664_v17  ;;  %v1673_v27 = vld [vmem:[#allocation7 + $0x40] ss:$8 sps:$4 sm:$0xff]   ;;  %v1674_v28 = vld [vmem:[#allocation7 + $0x54] ss:$8 sps:$4 sm:$0xff]   ;;  %v1676_v29 = vld [vmem:[#allocation7 + $0x50] ss:$8 sps:$4 sm:$0xff]  }
  0xab   : > { %528 = vmatprep.subr.bf16.mxu0 %v1637_v7  ;;  %875 = vmatprep.subr.bf16.mxu1 %v1665_v18  ;;  %v1677_v31 = vld [vmem:[#allocation7 + $0x64] ss:$8 sps:$4 sm:$0xff]   ;;  %v1679_v32 = vld [vmem:[#allocation7 + $0x60] ss:$8 sps:$4 sm:$0xff]   ;;  %v1680_v33 = vld [vmem:[#allocation7 + $0x74] ss:$8 sps:$4 sm:$0xff]  }
  0xac   : > { %v1682_v34 = vld [vmem:[#allocation7 + $0x70] ss:$8 sps:$4 sm:$0xff]   ;;  %v1683_v36 = vld [vmem:[#allocation7 + $0x84] ss:$8 sps:$4 sm:$0xff]   ;;  %v1685_v37 = vld [vmem:[#allocation7 + $0x80] ss:$8 sps:$4 sm:$0xff]  }
  0xad   : > { %v1686_v38 = vld [vmem:[#allocation7 + $0x94] ss:$8 sps:$4 sm:$0xff]   ;;  %v1688_v39 = vld [vmem:[#allocation7 + $0x90] ss:$8 sps:$4 sm:$0xff]   ;;  %v1689_v41 = vld [vmem:[#allocation7 + $0xa4] ss:$8 sps:$4 sm:$0xff]  }
  0xae   : > { %529 = vmatpush1.bf16.msra.mxu0 %v1639_v8  ;;  %876 = vmatpush1.bf16.msra.mxu1 %v1667_v21  ;;  %v1691_v42 = vld [vmem:[#allocation7 + $0xa0] ss:$8 sps:$4 sm:$0xff]   ;;  %v1692_v43 = vld [vmem:[#allocation7 + $0xb4] ss:$8 sps:$4 sm:$0xff]   ;;  %v1694_v44 = vld [vmem:[#allocation7 + $0xb0] ss:$8 sps:$4 sm:$0xff]  }
  0xaf   : > { %530 = vmatprep.subr.bf16.mxu0 %v1640_v9  ;;  %877 = vmatprep.subr.bf16.mxu1 %v1668_v22  ;;  %v1656_v45 = vld [vmem:[%s2158_s24 + $0x20] sm:$0xff]   ;;  %v1657_v49 = vld [vmem:[%s2158_s24 + $0x28] sm:$0xff]   ;;  %v1658_v50 = vld [vmem:[%s2158_s24 + $0x30] sm:$0xff]   ;;  %v392_v6 = vsub.s32 0, %v2207_v5  ;;  %v396_v8 = vsub.s32 1, %v2207_v5  ;;  %s2303_s9 = scalar_lea.vmem [#allocation10], %s1548_s19 }
  0xb0   : > { %v1695_v46 = vld [vmem:[#allocation7 + $0xc4] ss:$8 sps:$4 sm:$0xff]   ;;  %v1697_v47 = vld [vmem:[#allocation7 + $0xc0] ss:$8 sps:$4 sm:$0xff]   ;;  %v1698_v48 = vld [vmem:[#allocation7 + $0xd4] ss:$8 sps:$4 sm:$0xff]  }
  0xb1   : > { %v1700_v51 = vld [vmem:[#allocation7 + $0xd0] ss:$8 sps:$4 sm:$0xff]   ;;  %v1701_v52 = vld [vmem:[#allocation7 + $0xe4] ss:$8 sps:$4 sm:$0xff]   ;;  %v1703_v53 = vld [vmem:[#allocation7 + $0xe0] ss:$8 sps:$4 sm:$0xff]  }
  0xb2   : > { %531 = vmatpush1.bf16.msra.mxu0 %v1642_v10  ;;  %878 = vmatpush1.bf16.msra.mxu1 %v1670_v24  ;;  %v1704_v54 = vld [vmem:[#allocation7 + $0xf4] ss:$8 sps:$4 sm:$0xff]   ;;  %v1706_v55 = vld [vmem:[#allocation7 + $0xf0] ss:$8 sps:$4 sm:$0xff]   ;;  %v1707_v56 = vld [vmem:[#allocation8 + $0x40] sm:$0xff]   ;;  %p2430_p1 = scmp.ne.s32.totalorder %s2416_s13, 0 }
  0xb3   : > { %532 = vmatprep.subr.bf16.mxu0 %v1643_v11  ;;  %879 = vmatprep.subr.bf16.mxu1 %v1671_v26  ;;  %v1708_v57 = vld [vmem:[#allocation8] sm:$0xff]   ;;  %v1709_v58 = vld [vmem:[#allocation8 + $0x48] sm:$0xff]   ;;  %v1711_v60 = vld [vmem:[#allocation8 + $0x50] sm:$0xff]   ;;  %s1262_s10 = smul.u32 (%p2430_p1), 14, %s1986_s28 }
  0xb4   : > { %v1710_v59 = vld [vmem:[#allocation8 + $0x8] sm:$0xff]   ;;  %v2186_v61 = vld [vmem:[#allocation8 + $0x10] sm:$0xff]   ;;  %v2188_v62 = vld [vmem:[#allocation8 + $0x58] sm:$0xff]  }
  0xb5   : > { %v2191_v63 = vld [vmem:[#allocation8 + $0x18] sm:$0xff]   ;;  %v2197_v1 = vld [vmem:[#allocation8 + $0x20] sm:$0xff]   ;;  %v2200_v2 = vld [vmem:[#allocation8 + $0x68] sm:$0xff]   ;;  %s1263_s8 = ssub.s32 (%p2430_p1), 25, %s1262_s10 }
  0xb6   : > { %533 = vmatpush1.bf16.msra.mxu0 %v1645_v12  ;;  %880 = vmatpush1.bf16.msra.mxu1 %v1673_v27  ;;  %v2203_v3 = vld [vmem:[#allocation8 + $0x28] sm:$0xff]   ;;  %v388_v7 = vld [vmem:[%s2397_s2] sm:$0x3]  ;;  %p1264_p3 = scmp.lt.s32.totalorder (%p2430_p1), %s1263_s8, 14 }
  0xb7   : > { %534 = vmatprep.subr.bf16.mxu0 %v1646_v16  ;;  %881 = vmatprep.subr.bf16.mxu1 %v1674_v28  ;;  %v2216_v9 = vrot.slane %v388_v7, %v392_v6  ;;  %v2220_v10 = vrot.slane %v388_v7, %v396_v8 }
  0xba   : > { %535 = vmatpush1.bf16.msra.mxu0 %v1648_v19  ;;  %882 = vmatpush1.bf16.msra.mxu1 %v1676_v29 }
  0xbb   : > { %536 = vmatprep.subr.bf16.mxu0 %v1649_v20  ;;  %883 = vmatprep.subr.bf16.mxu1 %v1677_v31 }
  0xbe   : > { %537 = vmatpush1.bf16.msra.mxu0 %v1651_v23  ;;  %884 = vmatpush1.bf16.msra.mxu1 %v1679_v32 }
  0xbf   : > { %885 = vmatprep.subr.bf16.mxu1 %v1680_v33  ;;  %1472 = vmatprep.subr.bf16.mxu0 %v1707_v56 }
  0xc1   : > { %555 = vmatmul.mubr.bf16.vlgmr.msra.gmra.mrb[0].mxu0 %v1652_v25 }
  0xc2   : > { %564 = vmatprep.mubr.bf16.mxu0 %v1921_v0  ;;  %886 = vmatpush1.bf16.msra.mxu1 %v1682_v34 }
  0xc3   : > { %887 = vmatprep.subr.bf16.mxu1 %v1683_v36  ;;  %1473 = vmatpush3.bf16.msra.mxu0 %v1708_v57 }
  0xc4   : > { %1474 = vmatprep.subr.bf16.mxu0 %v1709_v58 }
  0xc6   : > { %888 = vmatpush1.bf16.msra.mxu1 %v1685_v37 }
  0xc7   : > { %889 = vmatprep.subr.bf16.mxu1 %v1686_v38  ;;  %1475 = vmatpush3.bf16.msra.mxu0 %v1710_v59 }
  0xc8   : > { %1476 = vmatprep.subr.bf16.mxu0 %v1711_v60 }
  0xc9   : > { %565 = vmatmul.mubr.bf16.gmra.mrb[4].mxu0 %v1653_v30 }
  0xca   : > { %574 = vmatprep.mubr.bf16.mxu0 %v1921_v0  ;;  %890 = vmatpush1.bf16.msra.mxu1 %v1688_v39 }
  0xcb   : > { %891 = vmatprep.subr.bf16.mxu1 %v1689_v41  ;;  %1477 = vmatpush3.bf16.msra.mxu0 %v2186_v61 }
  0xcc   : > { %1478 = vmatprep.subr.bf16.mxu0 %v2188_v62 }
  0xce   : > { %892 = vmatpush1.bf16.msra.mxu1 %v1691_v42 }
  0xcf   : > { %893 = vmatprep.subr.bf16.mxu1 %v1692_v43  ;;  %1479 = vmatpush3.bf16.msra.mxu0 %v2191_v63 }
  0xd1   : > { %575 = vmatmul.mubr.bf16.gmra.mrb[8].mxu0 %v1654_v35 }
  0xd2   : > { %584 = vmatprep.mubr.bf16.mxu0 %v1921_v0  ;;  %894 = vmatpush1.bf16.msra.mxu1 %v1694_v44 }
  0xd3   : > { %895 = vmatprep.subr.bf16.mxu1 %v1695_v46 }
  0xd6   : > { %896 = vmatpush1.bf16.msra.mxu1 %v1697_v47 }
  0xd7   : > { %897 = vmatprep.subr.bf16.mxu1 %v1698_v48 }
  0xd9   : > { %585 = vmatmul.mubr.bf16.gmra.mrb[12].mxu0 %v1655_v40 }
  0xda   : > { %594 = vmatprep.mubr.bf16.mxu0 %v1921_v0  ;;  %898 = vmatpush1.bf16.msra.mxu1 %v1700_v51 }
  0xdb   : > { %899 = vmatprep.subr.bf16.mxu1 %v1701_v52 }
  0xde   : > { %900 = vmatpush1.bf16.msra.mxu1 %v1703_v53 }
  0xdf   : > { %901 = vmatprep.subr.bf16.mxu1 %v1704_v54 }
  0xe1   : > { %595 = vmatmul.mubr.bf16.gmra.mrb[16].mxu0 %v1656_v45 }
  0xe2   : > { %604 = vmatprep.mubr.bf16.mxu0 %v1921_v0  ;;  %902 = vmatpush1.bf16.msra.mxu1 %v1706_v55 }
  0xe3   : > { %1530 = vmatprep.subr.bf16.mxu1 %v1707_v56 }
  0xe9   : > { %605 = vmatmul.mubr.bf16.gmra.mrb[20].mxu0 %v1657_v49 }
  0xea   : > { %614 = vmatprep.mubr.bf16.mxu0 %v1921_v0  ;;  %v2194_v0 = vld [vmem:[#allocation8 + $0x60] sm:$0xff]  }
  0xeb   : > { %1480 = vmatprep.subr.bf16.mxu0 %v2194_v0 }
  0xec   : > { %1481 = vmatpush3.bf16.msra.mxu0 %v2197_v1 }
  0xed   : > { %1482 = vmatprep.subr.bf16.mxu0 %v2200_v2 }
  0xf0   : > { %1483 = vmatpush3.bf16.msra.mxu0 %v2203_v3 }
  0xf1   : > { %615 = vmatmul.mubr.bf16.gmra.mrb[24].mxu0 %v1658_v50 }
 0x194   : > { %v556_v11 = vpop.f32.mrb[0].mxu0 }
 0x195   : > { %v557_v12 = vadd.f32 %v556_v11, %v2216_v9  ;;  %v558_v13 = vpop.f32.mrb[1].mxu0 }
 0x196   : > { %v559_v14 = vadd.f32 %v558_v13, %v2220_v10  ;;  %v560_v15 = vpop.f32.mrb[2].mxu0 }
 0x197   : > { %v561_v16 = vadd.f32 %v560_v15, %v2216_v9  ;;  %v562_v17 = vpop.f32.mrb[3].mxu0  ;;  %v625_v19 = vmax.f32 %v557_v12, 0.0 }
 0x198   : > { %v563_v18 = vadd.f32 %v562_v17, %v2220_v10  ;;  %v626_v21 = vmax.f32 %v559_v14, 0.0 }
 0x199   : > { %v627_v20 = vmax.f32 %v561_v16, 0.0 }
 0x19a   : > { %v628_v22 = vmax.f32 %v563_v18, 0.0 }
 0x19b   : > { %v653_v23 = vpack.c.bf16 %v627_v20, %v625_v19 }
 0x19c   : > { %v566_v24 = vpop.f32.mrb[4].mxu0  ;;  %v654_v25 = vpack.c.bf16 %v628_v22, %v626_v21 }
 0x19d   : > { %v567_v26 = vadd.f32 %v566_v24, %v2216_v9  ;;  %v568_v27 = vpop.f32.mrb[5].mxu0 }
 0x19e   : > { %v569_v28 = vadd.f32 %v568_v27, %v2220_v10  ;;  %v570_v29 = vpop.f32.mrb[6].mxu0  ;;  %903 = vmatprep.mubr.bf16.mxu1 %v654_v25 }
 0x19f   : > { %v571_v30 = vadd.f32 %v570_v29, %v2216_v9  ;;  %v572_v31 = vpop.f32.mrb[7].mxu0  ;;  %904 = vmatmul.mubr.bf16.vlgmr.msra.gmra.mrb[0].mxu1 %v653_v23  ;;  %v629_v33 = vmax.f32 %v567_v26, 0.0 }
 0x1a0   : > { %v573_v32 = vadd.f32 %v572_v31, %v2220_v10  ;;  %1538 = vmatpush3.bf16.msra.mxu1 %v1708_v57  ;;  %v630_v35 = vmax.f32 %v569_v28, 0.0 }
 0x1a1   : > { %v631_v34 = vmax.f32 %v571_v30, 0.0  ;;  %1531 = vmatprep.subr.bf16.mxu1 %v1709_v58 }
 0x1a2   : > { %v632_v36 = vmax.f32 %v573_v32, 0.0 }
 0x1a3   : > { %v655_v37 = vpack.c.bf16 %v631_v34, %v629_v33 }
 0x1a4   : > { %v656_v38 = vpack.c.bf16 %v632_v36, %v630_v35  ;;  %v576_v39 = vpop.f32.mrb[8].mxu0  ;;  %1539 = vmatpush3.bf16.msra.mxu1 %v1710_v59 }
 0x1a5   : > { %v577_v40 = vadd.f32 %v576_v39, %v2216_v9  ;;  %v578_v41 = vpop.f32.mrb[9].mxu0  ;;  %1532 = vmatprep.subr.bf16.mxu1 %v1711_v60 }
 0x1a6   : > { %v579_v42 = vadd.f32 %v578_v41, %v2220_v10  ;;  %v580_v43 = vpop.f32.mrb[10].mxu0  ;;  %913 = vmatprep.mubr.bf16.mxu1 %v656_v38 }
 0x1a7   : > { %v581_v44 = vadd.f32 %v580_v43, %v2216_v9  ;;  %v582_v45 = vpop.f32.mrb[11].mxu0  ;;  %914 = vmatmul.mubr.bf16.gmra.mrb[4].mxu1 %v655_v37  ;;  %v633_v47 = vmax.f32 %v577_v40, 0.0 }
 0x1a8   : > { %v583_v46 = vadd.f32 %v582_v45, %v2220_v10  ;;  %1540 = vmatpush3.bf16.msra.mxu1 %v2186_v61  ;;  %v634_v49 = vmax.f32 %v579_v42, 0.0 }
 0x1a9   : > { %v635_v48 = vmax.f32 %v581_v44, 0.0  ;;  %1533 = vmatprep.subr.bf16.mxu1 %v2188_v62 }
 0x1aa   : > { %v636_v50 = vmax.f32 %v583_v46, 0.0 }
 0x1ab   : > { %v657_v51 = vpack.c.bf16 %v635_v48, %v633_v47 }
 0x1ac   : > { %v658_v52 = vpack.c.bf16 %v636_v50, %v634_v49  ;;  %v586_v53 = vpop.f32.mrb[12].mxu0  ;;  %1541 = vmatpush3.bf16.msra.mxu1 %v2191_v63  ;;  %v1719_v50 = vld [vmem:[#allocation8 + $0x70] sm:$0xff]  }
 0x1ad   : > { %v587_v54 = vadd.f32 %v586_v53, %v2216_v9  ;;  %v588_v55 = vpop.f32.mrb[13].mxu0  ;;  %1534 = vmatprep.subr.bf16.mxu1 %v2194_v0  ;;  %1484 = vmatprep.subr.bf16.mxu0 %v1719_v50 }
 0x1ae   : > { %v589_v56 = vadd.f32 %v588_v55, %v2220_v10  ;;  %v590_v57 = vpop.f32.mrb[14].mxu0  ;;  %923 = vmatprep.mubr.bf16.mxu1 %v658_v52  ;;  %v1721_v52 = vld [vmem:[#allocation8 + $0x78] sm:$0xff]  }
 0x1af   : > { %v591_v58 = vadd.f32 %v590_v57, %v2216_v9  ;;  %v592_v59 = vpop.f32.mrb[15].mxu0  ;;  %924 = vmatmul.mubr.bf16.gmra.mrb[8].mxu1 %v657_v51  ;;  %v637_v61 = vmax.f32 %v587_v54, 0.0  ;;  %v1720_v51 = vld [vmem:[#allocation8 + $0x30] sm:$0xff]  }
 0x1b0   : > { %v593_v60 = vadd.f32 %v592_v59, %v2220_v10  ;;  %1542 = vmatpush3.bf16.msra.mxu1 %v2197_v1  ;;  %v638_v63 = vmax.f32 %v589_v56, 0.0  ;;  %1485 = vmatpush3.bf16.msra.mxu0 %v1720_v51 }
 0x1b1   : > { %v639_v62 = vmax.f32 %v591_v58, 0.0  ;;  %1535 = vmatprep.subr.bf16.mxu1 %v2200_v2  ;;  %1486 = vmatprep.subr.bf16.mxu0 %v1721_v52 }
 0x1b2   : > { %v640_v4 = vmax.f32 %v593_v60, 0.0 }
 0x1b3   : > { %v659_v7 = vpack.c.bf16 %v639_v62, %v637_v61 }
 0x1b4   : > { %v660_v0 = vpack.c.bf16 %v640_v4, %v638_v63  ;;  %v596_v11 = vpop.f32.mrb[16].mxu0  ;;  %1543 = vmatpush3.bf16.msra.mxu1 %v2203_v3 }
 0x1b5   : > { %v597_v12 = vadd.f32 %v596_v11, %v2216_v9  ;;  %v598_v13 = vpop.f32.mrb[17].mxu0  ;;  %1536 = vmatprep.subr.bf16.mxu1 %v1719_v50 }
 0x1b6   : > { %v599_v14 = vadd.f32 %v598_v13, %v2220_v10  ;;  %v600_v15 = vpop.f32.mrb[18].mxu0  ;;  %933 = vmatprep.mubr.bf16.mxu1 %v660_v0 }
 0x1b7   : > { %v601_v1 = vadd.f32 %v600_v15, %v2216_v9  ;;  %v602_v16 = vpop.f32.mrb[19].mxu0  ;;  %934 = vmatmul.mubr.bf16.gmra.mrb[12].mxu1 %v659_v7  ;;  %v641_v17 = vmax.f32 %v597_v12, 0.0 }
 0x1b8   : > { %v603_v2 = vadd.f32 %v602_v16, %v2220_v10  ;;  %v642_v19 = vmax.f32 %v599_v14, 0.0  ;;  %1544 = vmatpush3.bf16.msra.mxu1 %v1720_v51 }
 0x1b9   : > { %v643_v18 = vmax.f32 %v601_v1, 0.0  ;;  %1537 = vmatprep.subr.bf16.mxu1 %v1721_v52 }
 0x1ba   : > { %v644_v20 = vmax.f32 %v603_v2, 0.0 }
 0x1bb   : > { %v661_v21 = vpack.c.bf16 %v643_v18, %v641_v17 }
 0x1bc   : > { %v662_v22 = vpack.c.bf16 %v644_v20, %v642_v19  ;;  %v606_v3 = vpop.f32.mrb[20].mxu0 }
 0x1bd   : > { %v607_v23 = vadd.f32 %v606_v3, %v2216_v9  ;;  %v608_v24 = vpop.f32.mrb[21].mxu0 }
 0x1be   : > { %v609_v25 = vadd.f32 %v608_v24, %v2220_v10  ;;  %v610_v26 = vpop.f32.mrb[22].mxu0  ;;  %943 = vmatprep.mubr.bf16.mxu1 %v662_v22 }
 0x1bf   : > { %v611_v27 = vadd.f32 %v610_v26, %v2216_v9  ;;  %v612_v28 = vpop.f32.mrb[23].mxu0  ;;  %944 = vmatmul.mubr.bf16.gmra.mrb[16].mxu1 %v661_v21  ;;  %v645_v30 = vmax.f32 %v607_v23, 0.0 }
 0x1c0   : > { %v613_v29 = vadd.f32 %v612_v28, %v2220_v10  ;;  %v646_v32 = vmax.f32 %v609_v25, 0.0 }
 0x1c1   : > { %v647_v31 = vmax.f32 %v611_v27, 0.0 }
 0x1c2   : > { %v648_v33 = vmax.f32 %v613_v29, 0.0 }
 0x1c3   : > { %v663_v34 = vpack.c.bf16 %v647_v31, %v645_v30 }
 0x1c4   : > { %v664_v35 = vpack.c.bf16 %v648_v33, %v646_v32  ;;  %v616_v36 = vpop.f32.mrb[24].mxu0 }
 0x1c5   : > { %v617_v37 = vadd.f32 %v616_v36, %v2216_v9  ;;  %v618_v38 = vpop.f32.mrb[25].mxu0 }
 0x1c6   : > { %v619_v39 = vadd.f32 %v618_v38, %v2220_v10  ;;  %v620_v40 = vpop.f32.mrb[26].mxu0  ;;  %953 = vmatprep.mubr.bf16.mxu1 %v664_v35 }
 0x1c7   : > { %v621_v41 = vadd.f32 %v620_v40, %v2216_v9  ;;  %v622_v42 = vpop.f32.mrb[27].mxu0  ;;  %954 = vmatmul.mubr.bf16.gmra.mrb[20].mxu1 %v663_v34  ;;  %v649_v44 = vmax.f32 %v617_v37, 0.0  ;;  %v1722_v9 = vld [vmem:[#allocation8 + $0x38] sm:$0xff]  }
 0x1c8   : > { %v623_v43 = vadd.f32 %v622_v42, %v2220_v10  ;;  %v650_v46 = vmax.f32 %v619_v39, 0.0  ;;  %1487 = vmatpush3.bf16.msra.mxu0 %v1722_v9  ;;  %1545 = vmatpush3.bf16.msra.mxu1 %v1722_v9  ;;  %v699_v10 = vld [vmem:[%s2399_s4] sm:$0x3] }
 0x1c9   : > { %v651_v45 = vmax.f32 %v621_v41, 0.0  ;;  %v2262_v53 = vrot.slane %v699_v10, %v392_v6  ;;  %v2266_v54 = vrot.slane %v699_v10, %v396_v8 }
 0x1ca   : > { %v652_v47 = vmax.f32 %v623_v43, 0.0 }
 0x1cb   : > { %v665_v48 = vpack.c.bf16 %v651_v45, %v649_v44 }
 0x1cc   : > { %v666_v49 = vpack.c.bf16 %v652_v47, %v650_v46 }
 0x1ce   : > { %963 = vmatprep.mubr.bf16.mxu1 %v666_v49 }
 0x1cf   : > { %964 = vmatmul.mubr.bf16.gmra.mrb[24].mxu1 %v665_v48 }
 0x272   : > { %v905_v55 = vpop.f32.mrb[0].mxu1 }
 0x273   : > { %v906_v56 = vadd.f32 %v905_v55, %v2262_v53  ;;  %v907_v57 = vpop.f32.mrb[1].mxu1 }
 0x274   : > { %v908_v58 = vadd.f32 %v907_v57, %v2266_v54  ;;  %v909_v59 = vpop.f32.mrb[2].mxu1 }
 0x275   : > { %v910_v60 = vadd.f32 %v909_v59, %v2262_v53  ;;  %v911_v61 = vpop.f32.mrb[3].mxu1  ;;  %v974_v63 = vmax.f32 %v906_v56, 0.0 }
 0x276   : > { %v912_v62 = vadd.f32 %v911_v61, %v2266_v54  ;;  %v975_v6 = vmax.f32 %v908_v58, 0.0 }
 0x277   : > { %v976_v4 = vmax.f32 %v910_v60, 0.0 }
 0x278   : > { %v977_v7 = vmax.f32 %v912_v62, 0.0 }
 0x279   : > { %v1002_v0 = vpack.c.bf16 %v976_v4, %v974_v63 }
 0x27a   : > { %v1003_v5 = vpack.c.bf16 %v977_v7, %v975_v6  ;;  %v915_v8 = vpop.f32.mrb[4].mxu1 }
 0x27b   : > { %v916_v11 = vadd.f32 %v915_v8, %v2262_v53  ;;  %v917_v12 = vpop.f32.mrb[5].mxu1 }
 0x27c   : > { %v918_v13 = vadd.f32 %v917_v12, %v2266_v54  ;;  %v919_v14 = vpop.f32.mrb[6].mxu1  ;;  %1183 = vmatprep.mubr.bf16.mxu0 %v1003_v5 }
 0x27d   : > { %v920_v15 = vadd.f32 %v919_v14, %v2262_v53  ;;  %v921_v1 = vpop.f32.mrb[7].mxu1  ;;  %1184 = vmatmul.mubr.bf16.vlgmr.msra.gmra.mrb[28].mxu0 %v1002_v0  ;;  %v978_v2 = vmax.f32 %v916_v11, 0.0 }
 0x27e   : > { %v922_v16 = vadd.f32 %v921_v1, %v2266_v54  ;;  %v979_v18 = vmax.f32 %v918_v13, 0.0 }
 0x27f   : > { %v980_v17 = vmax.f32 %v920_v15, 0.0 }
 0x280   : > { %v981_v19 = vmax.f32 %v922_v16, 0.0 }
 0x281   : > { %v1004_v20 = vpack.c.bf16 %v980_v17, %v978_v2 }
 0x282   : > { %v1005_v21 = vpack.c.bf16 %v981_v19, %v979_v18  ;;  %v925_v22 = vpop.f32.mrb[8].mxu1 }
 0x283   : > { %v926_v3 = vadd.f32 %v925_v22, %v2262_v53  ;;  %v927_v23 = vpop.f32.mrb[9].mxu1 }
 0x284   : > { %v928_v24 = vadd.f32 %v927_v23, %v2266_v54  ;;  %v929_v25 = vpop.f32.mrb[10].mxu1  ;;  %1191 = vmatprep.mubr.bf16.mxu0 %v1005_v21 }
 0x285   : > { %v930_v26 = vadd.f32 %v929_v25, %v2262_v53  ;;  %v931_v27 = vpop.f32.mrb[11].mxu1  ;;  %1192 = vmatmul.mubr.bf16.gmra.mrb[32].mxu0 %v1004_v20  ;;  %v982_v29 = vmax.f32 %v926_v3, 0.0 }
 0x286   : > { %v932_v28 = vadd.f32 %v931_v27, %v2266_v54  ;;  %v983_v31 = vmax.f32 %v928_v24, 0.0 }
 0x287   : > { %v984_v30 = vmax.f32 %v930_v26, 0.0 }
 0x288   : > { %v985_v32 = vmax.f32 %v932_v28, 0.0 }
 0x289   : > { %v1006_v33 = vpack.c.bf16 %v984_v30, %v982_v29  ;;  %v2300_v30 = vld [vmem:[%s2401_s6] ss:$0 sm:$0xff] }
 0x28a   : > { %v1007_v34 = vpack.c.bf16 %v985_v32, %v983_v31  ;;  %v935_v35 = vpop.f32.mrb[12].mxu1 }
 0x28b   : > { %v936_v36 = vadd.f32 %v935_v35, %v2262_v53  ;;  %v937_v37 = vpop.f32.mrb[13].mxu1 }
 0x28c   : > { %v938_v38 = vadd.f32 %v937_v37, %v2266_v54  ;;  %v939_v39 = vpop.f32.mrb[14].mxu1  ;;  %1199 = vmatprep.mubr.bf16.mxu0 %v1007_v34 }
 0x28d   : > { %v940_v40 = vadd.f32 %v939_v39, %v2262_v53  ;;  %v941_v41 = vpop.f32.mrb[15].mxu1  ;;  %1200 = vmatmul.mubr.bf16.gmra.mrb[36].mxu0 %v1006_v33  ;;  %v986_v43 = vmax.f32 %v936_v36, 0.0 }
 0x28e   : > { %v942_v42 = vadd.f32 %v941_v41, %v2266_v54  ;;  %v987_v45 = vmax.f32 %v938_v38, 0.0 }
 0x28f   : > { %v988_v44 = vmax.f32 %v940_v40, 0.0 }
 0x290   : > { %v989_v46 = vmax.f32 %v942_v42, 0.0 }
 0x291   : > { %v1008_v47 = vpack.c.bf16 %v988_v44, %v986_v43 }
 0x292   : > { %v1009_v48 = vpack.c.bf16 %v989_v46, %v987_v45  ;;  %v945_v49 = vpop.f32.mrb[16].mxu1 }
 0x293   : > { %v946_v50 = vadd.f32 %v945_v49, %v2262_v53  ;;  %v947_v51 = vpop.f32.mrb[17].mxu1 }
 0x294   : > { %v948_v52 = vadd.f32 %v947_v51, %v2266_v54  ;;  %v949_v9 = vpop.f32.mrb[18].mxu1  ;;  %1207 = vmatprep.mubr.bf16.mxu0 %v1009_v48 }
 0x295   : > { %v950_v10 = vadd.f32 %v949_v9, %v2262_v53  ;;  %v951_v55 = vpop.f32.mrb[19].mxu1  ;;  %1208 = vmatmul.mubr.bf16.gmra.mrb[40].mxu0 %v1008_v47  ;;  %v990_v57 = vmax.f32 %v946_v50, 0.0 }
 0x296   : > { %v952_v56 = vadd.f32 %v951_v55, %v2266_v54  ;;  %v991_v59 = vmax.f32 %v948_v52, 0.0 }
 0x297   : > { %v992_v58 = vmax.f32 %v950_v10, 0.0 }
 0x298   : > { %v993_v60 = vmax.f32 %v952_v56, 0.0 }
 0x299   : > { %v1010_v61 = vpack.c.bf16 %v992_v58, %v990_v57 }
 0x29a   : > { %v1011_v62 = vpack.c.bf16 %v993_v60, %v991_v59  ;;  %v955_v63 = vpop.f32.mrb[20].mxu1 }
 0x29b   : > { %v956_v4 = vadd.f32 %v955_v63, %v2262_v53  ;;  %v957_v6 = vpop.f32.mrb[21].mxu1 }
 0x29c   : > { %v958_v7 = vadd.f32 %v957_v6, %v2266_v54  ;;  %v959_v0 = vpop.f32.mrb[22].mxu1  ;;  %1215 = vmatprep.mubr.bf16.mxu0 %v1011_v62 }
 0x29d   : > { %v960_v5 = vadd.f32 %v959_v0, %v2262_v53  ;;  %v961_v8 = vpop.f32.mrb[23].mxu1  ;;  %1216 = vmatmul.mubr.bf16.gmra.mrb[44].mxu0 %v1010_v61  ;;  %v994_v12 = vmax.f32 %v956_v4, 0.0 }
 0x29e   : > { %v962_v11 = vadd.f32 %v961_v8, %v2266_v54  ;;  %v995_v14 = vmax.f32 %v958_v7, 0.0 }
 0x29f   : > { %v996_v13 = vmax.f32 %v960_v5, 0.0 }
 0x2a0   : > { %v997_v15 = vmax.f32 %v962_v11, 0.0 }
 0x2a1   : > { %v1012_v1 = vpack.c.bf16 %v996_v13, %v994_v12 }
 0x2a2   : > { %v1013_v16 = vpack.c.bf16 %v997_v15, %v995_v14  ;;  %v965_v2 = vpop.f32.mrb[24].mxu1 }
 0x2a3   : > { %v966_v17 = vadd.f32 %v965_v2, %v2262_v53  ;;  %v967_v18 = vpop.f32.mrb[25].mxu1 }
 0x2a4   : > { %v968_v19 = vadd.f32 %v967_v18, %v2266_v54  ;;  %v969_v20 = vpop.f32.mrb[26].mxu1  ;;  %1223 = vmatprep.mubr.bf16.mxu0 %v1013_v16 }
 0x2a5   : > { %v970_v21 = vadd.f32 %v969_v20, %v2262_v53  ;;  %v971_v22 = vpop.f32.mrb[27].mxu1  ;;  %1224 = vmatmul.mubr.bf16.gmra.mrb[48].mxu0 %v1012_v1  ;;  %v998_v23 = vmax.f32 %v966_v17, 0.0 }
 0x2a6   : > { %v972_v3 = vadd.f32 %v971_v22, %v2266_v54  ;;  %v999_v25 = vmax.f32 %v968_v19, 0.0 }
 0x2a7   : > { %v1000_v24 = vmax.f32 %v970_v21, 0.0 }
 0x2a8   : > { %v1001_v26 = vmax.f32 %v972_v3, 0.0 }
 0x2a9   : > { %v1014_v27 = vpack.c.bf16 %v1000_v24, %v998_v23 }
 0x2aa   : > { %v1015_v28 = vpack.c.bf16 %v1001_v26, %v999_v25 }
 0x2ac   : > { %1231 = vmatprep.mubr.bf16.mxu1 %v1015_v28 }
 0x2ad   : > { %1232 = vmatmul.mubr.bf16.vlgmr.msra.gmra.mrb[28].mxu1 %v1014_v27 }
 0x350   : > { %v1488_v29 = vpop.f32.mrb[28].mxu0 }
 0x351   : > { %v1489_v53 = vpop.f32.mrb[29].mxu0 }
 0x352   : > { %v1490_v31 = vadd.f32 %v1489_v53, %v1488_v29  ;;  %v1491_v32 = vpop.f32.mrb[30].mxu0 }
 0x353   : > { %v1492_v33 = vpop.f32.mrb[31].mxu0 }
 0x354   : > { %v1186_v54 = vadd.f32 %v1490_v31, %v2300_v30  ;;  %v1493_v34 = vadd.f32 %v1492_v33, %v1491_v32 }
 0x356   : > { %1240 = vst [vmem:[%s2303_s9] sm:$0xff] %v1186_v54  ;;  %v1189_v35 = vadd.f32 %v1493_v34, %v2300_v30 }
 0x358   : > { %1241 = vst [vmem:[%s2303_s9 + $0x8] sm:$0xff] %v1189_v35  ;;  %v1494_v36 = vpop.f32.mrb[32].mxu0 }
 0x359   : > { %v1495_v37 = vpop.f32.mrb[33].mxu0 }
 0x35a   : > { %v1496_v38 = vadd.f32 %v1495_v37, %v1494_v36  ;;  %v1497_v39 = vpop.f32.mrb[34].mxu0 }
 0x35b   : > { %v1498_v40 = vpop.f32.mrb[35].mxu0 }
 0x35c   : > { %v1194_v41 = vadd.f32 %v1496_v38, %v2300_v30  ;;  %v1499_v42 = vadd.f32 %v1498_v40, %v1497_v39 }
 0x35e   : > { %1242 = vst [vmem:[%s2303_s9 + $0x10] sm:$0xff] %v1194_v41  ;;  %v1197_v43 = vadd.f32 %v1499_v42, %v2300_v30 }
 0x360   : > { %1243 = vst [vmem:[%s2303_s9 + $0x18] sm:$0xff] %v1197_v43  ;;  %v1500_v44 = vpop.f32.mrb[36].mxu0 }
 0x361   : > { %v1501_v45 = vpop.f32.mrb[37].mxu0 }
 0x362   : > { %v1502_v46 = vadd.f32 %v1501_v45, %v1500_v44  ;;  %v1503_v47 = vpop.f32.mrb[38].mxu0 }
 0x363   : > { %v1504_v48 = vpop.f32.mrb[39].mxu0 }
 0x364   : > { %v1202_v49 = vadd.f32 %v1502_v46, %v2300_v30  ;;  %v1505_v50 = vadd.f32 %v1504_v48, %v1503_v47 }
 0x366   : > { %1244 = vst [vmem:[%s2303_s9 + $0x20] sm:$0xff] %v1202_v49  ;;  %v1205_v51 = vadd.f32 %v1505_v50, %v2300_v30 }
 0x368   : > { %1245 = vst [vmem:[%s2303_s9 + $0x28] sm:$0xff] %v1205_v51  ;;  %v1506_v52 = vpop.f32.mrb[40].mxu0 }
 0x369   : > { %v1507_v9 = vpop.f32.mrb[41].mxu0 }
 0x36a   : > { %v1508_v10 = vadd.f32 %v1507_v9, %v1506_v52  ;;  %v1509_v55 = vpop.f32.mrb[42].mxu0 }
 0x36b   : > { %v1510_v56 = vpop.f32.mrb[43].mxu0 }
 0x36c   : > { %v1210_v57 = vadd.f32 %v1508_v10, %v2300_v30  ;;  %v1511_v58 = vadd.f32 %v1510_v56, %v1509_v55 }
 0x36e   : > { %1246 = vst [vmem:[%s2303_s9 + $0x30] sm:$0xff] %v1210_v57  ;;  %v1213_v59 = vadd.f32 %v1511_v58, %v2300_v30 }
 0x370   : > { %1247 = vst [vmem:[%s2303_s9 + $0x38] sm:$0xff] %v1213_v59  ;;  %v1512_v60 = vpop.f32.mrb[44].mxu0 }
 0x371   : > { %v1513_v61 = vpop.f32.mrb[45].mxu0 }
 0x372   : > { %v1514_v62 = vadd.f32 %v1513_v61, %v1512_v60  ;;  %v1515_v63 = vpop.f32.mrb[46].mxu0 }
 0x373   : > { %v1516_v4 = vpop.f32.mrb[47].mxu0 }
 0x374   : > { %v1218_v6 = vadd.f32 %v1514_v62, %v2300_v30  ;;  %v1517_v7 = vadd.f32 %v1516_v4, %v1515_v63 }
 0x376   : > { %1248 = vst [vmem:[%s2303_s9 + $0x40] sm:$0xff] %v1218_v6  ;;  %v1221_v0 = vadd.f32 %v1517_v7, %v2300_v30 }
 0x378   : > { %1249 = vst [vmem:[%s2303_s9 + $0x48] sm:$0xff] %v1221_v0  ;;  %v1518_v5 = vpop.f32.mrb[48].mxu0 }
 0x379   : > { %v1519_v8 = vpop.f32.mrb[49].mxu0 }
 0x37a   : > { %v1520_v11 = vadd.f32 %v1519_v8, %v1518_v5  ;;  %v1521_v12 = vpop.f32.mrb[50].mxu0 }
 0x37b   : > { %v1522_v13 = vpop.f32.mrb[51].mxu0 }
 0x37c   : > { %v1226_v14 = vadd.f32 %v1520_v11, %v2300_v30  ;;  %v1523_v15 = vadd.f32 %v1522_v13, %v1521_v12 }
 0x37e   : > { %1250 = vst [vmem:[%s2303_s9 + $0x50] sm:$0xff] %v1226_v14  ;;  %v1229_v1 = vadd.f32 %v1523_v15, %v2300_v30 }
 0x380   : > { %1251 = vst [vmem:[%s2303_s9 + $0x58] sm:$0xff] %v1229_v1  ;;  %v1524_v16 = vpop.f32.mrb[28].mxu1 }
 0x381   : > { %v1525_v2 = vpop.f32.mrb[29].mxu1 }
 0x382   : > { %v1526_v17 = vadd.f32 %v1525_v2, %v1524_v16  ;;  %v1527_v18 = vpop.f32.mrb[30].mxu1  ;;  %1261 = sbr.rel (!%p2430_p1) target bundleno = 933 (0x3a5), region = 68 }
 0x383   : > { %v1528_v19 = vpop.f32.mrb[31].mxu1 }
 0x384   : > { %v1234_v20 = vadd.f32 %v1526_v17, %v2300_v30  ;;  %v1529_v21 = vadd.f32 %v1528_v19, %v1527_v18 }
 0x386   : > { %1252 = vst [vmem:[%s2303_s9 + $0x60] sm:$0xff] %v1234_v20  ;;  %v1237_v22 = vadd.f32 %v1529_v21, %v2300_v30 }
 0x388   : > { %1253 = vst [vmem:[%s2303_s9 + $0x68] sm:$0xff] %v1237_v22 }
 0x389   : > { %s2442_s8 = smov (!%p1264_p3, %s1263_s8), 14 }
 0x38a   : > { %s2336_s14 = sshll.u32 %s2442_s8, 7 }
 0x38b   : > { %s1268_s16 = ssub.s32 1792, %s2336_s14 }
 0x38c   : > { %1269 = vsyncadd %s1255_s30, %s1268_s16  ;;  %p1464_p6 = scmp.ne.s32.totalorder %s2336_s14, 0  ;;  %s1471_s13 = smul.u32 1792, %s1986_s28 }
 0x38d   : > { %s1274_s11 = sshll.u32 %s2303_s9, 4  ;;  %s1922_s12 = smov [#allocation10]   ;;  %s2349_s11 = int_to_ptr.vmem [resolvable:$true] %s1274_s11 }
 0x38e   : > { %s2347_s29 = scalar_lea.hbm %s2402_s7, %s1471_s13  ;;  %s1835_s24 = scalar_lea.vmem %s2349_s11, %s2336_s14 }
 0x38f   : > { %p1836_p5 = scmp.ne.s32.totalorder %s2349_s11, %s1835_s24  ;;  %s1839_s15 = sshll.u32 %s1922_s12, 4  ;;  %s1840_s15 = int_to_ptr.vmem [resolvable:$false] %s1839_s15 }
 0x390   : > { %s1841_s28 = scalar_lea.vmem %s1840_s15, 3584  ;;  %p1842_p0 = scmp.lt.s32.totalorder %s2349_s11, %s1840_s15 }
 0x391   : > { %p1837_p11 = pnand %p1836_p5, %p1464_p6  ;;  %p1843_p12 = scmp.lt.s32.totalorder %s1841_s28, %s1835_s24 }
 0x393   : > { %p1838_p13 = pneg %p1837_p11  ;;  %p1844_p7 = por %p1843_p12, %p1842_p0 }
 0x395   : > { %p1845_p2 = pnand %p1844_p7, %p1838_p13 }
 0x397   : > { %1848 = shalt.err (!%p1845_p2)
}
 0x398   : > { %s1849_s18 = scalar_lea.hbm %s2347_s29, %s2336_s14  ;;  %s1853_s20 = scalar_lea.hbm %s2402_s7, 3200 }
 0x399   : > { %p1850_p8 = scmp.ne.s32.totalorder %s2347_s29, %s1849_s18  ;;  %p1854_p1 = scmp.lt.u32.totalorder %s2347_s29, %s2402_s7 }
 0x39a   : > { %p1855_p3 = scmp.lt.u32.totalorder %s1853_s20, %s1849_s18  ;;  %p1857_p11 = scmp.lt.u32.totalorder %s1849_s18, %s2347_s29 }
 0x39b   : > { %p1851_p9 = pnand %p1850_p8, %p1464_p6 }
 0x39c   : > { %p1856_p5 = por %p1855_p3, %p1854_p1 }
 0x39d   : > { %p1852_p10 = pneg %p1851_p9 }
 0x39e   : > { %p1858_p13 = por %p1857_p11, %p1856_p5 }
 0x3a0   : > { %p1859_p0 = pnand %p1858_p13, %p1852_p10 }
 0x3a2   : > { %1862 = shalt.err (!%p1859_p0)
}
 0x3a3   : > { %s1923_s10 = smov 128   ;;  %s1924_s8 = smov 8  }
 0x3a4   : > { %1280 = dma.vmem_to_hbm [thread:$0]  (%p1464_p6), %s2349_s11, %s2336_s14, %s2347_s29, %s1255_s30, %s1923_s10, %s1923_s10, %s1924_s8  }
 0x3a5 PF: > { %s2431_s16 = sld [smem:[#allocation15_spill]]  ;;  %s2432_s13 = sld [smem:[#allocation18_spill]] }
 0x3ab   : > { %s1289_s21 = sand.u32 1, %s2431_s16   ;;  %p2433_p12 = scmp.ne.s32.totalorder %s2432_s13, 0 }
 0x3ac   : > { %s1290_s22 = scalar_lea.sflag [#allocation4], %s1289_s21 }
 0x3ad   : > { %p1574_p7 = pnand %p1381_p4, %p2433_p12 }
 0x3af   : > { %1892 = dma.done.wait (!%p1574_p7), %s1290_s22, 1792  }
 0x3b0   : > { %1894 = vsyncadd (!%p1574_p7), %s1290_s22, 4294965504  ;;  %s2434_s27 = sld [smem:[#allocation16_spill]]  ;;  %s2435_s12 = sld [smem:[#allocation17_spill]] }
 0x3b1   : > { %s2436_s24 = smov %s1901_s25  ;;  %s2437_s25 = smov %s1905_s26 }
 0x3b6   : > { %p22_p2 = scmp.ge.s32.totalorder %s2434_s27, 4   ;;  %s2438_s26 = smov %s2435_s12 }
 0x3b8   :  { %24 = sbr.rel (!%p22_p2) target bundleno = 9 (0x9), region = 105 }
 0x3bf   :  { %1295 = vsyncpa [#allocation3], 1 }
 0x3c0   :  { %1297 = vsyncpa [#allocation3 + $0x1], 1 }
 0x3c1   :  { %1298 = vsyncpa [#allocation6], 1 }
 0x3c2   :  { %1299 = vsyncpa [#allocation9], 1 }
 0x3c3   :  { %1300 = vsyncpa [#allocation4], 1 }
 0x3c4   :  { %1302 = vsyncpa [#allocation4 + $0x1], 1 }

</bundles_post_ra>
